<compile_context>
chip_gen: v7x
topology: tpu7x:2x2x1
jax: 0.10.0
libtpu: 0.0.40
codegen_flags: <defaults>
</compile_context>

<pallas_src>
import jax
import jax.numpy as jnp
from jax.experimental import pallas as pl
from jax.experimental.pallas import tpu as pltpu


# ----------------------------------------------------------------------------
# Kernels
# ----------------------------------------------------------------------------
def _conv_relu_pool_kernel(p00_ref, p01_ref, p10_ref, p11_ref, w_ref, b_ref, o_ref):
    """Fused conv (transposed matmul) + bias + ReLU + 2x2/2 max-pool.

    p??_ref : [Cin*K*K, TN]   im2col patches for pooling phase (dh, dw)
    w_ref   : [Cout, Cin*K*K] packed conv weight
    b_ref   : [Cout, 1]       bias (broadcast over lanes)
    o_ref   : [Cout, TN]      pooled output tile, lanes = flattened (b, hp, wp)
    """
    w = w_ref[...]
    y = jnp.dot(w, p00_ref[...], preferred_element_type=jnp.float32)
    y = jnp.maximum(y, jnp.dot(w, p01_ref[...], preferred_element_type=jnp.float32))
    y = jnp.maximum(y, jnp.dot(w, p10_ref[...], preferred_element_type=jnp.float32))
    y = jnp.maximum(y, jnp.dot(w, p11_ref[...], preferred_element_type=jnp.float32))
    y = y + b_ref[...]               # same bias for every phase -> add once, after the max
    o_ref[...] = jnp.maximum(y, 0.0).astype(o_ref.dtype)


def _fc_stack_kernel(x_ref, w1_ref, b1_ref, w2_ref, b2_ref, w3_ref, b3_ref, o_ref):
    """fc1 + ReLU -> fc2 + ReLU -> fc3, fully fused (weights stay VMEM resident)."""
    h = jnp.dot(x_ref[...], w1_ref[...], preferred_element_type=jnp.float32) + b1_ref[...]
    h = jnp.maximum(h, 0.0)
    h = jnp.dot(h, w2_ref[...], preferred_element_type=jnp.float32) + b2_ref[...]
    h = jnp.maximum(h, 0.0)
    h = jnp.dot(h, w3_ref[...], preferred_element_type=jnp.float32) + b3_ref[...]
    o_ref[...] = h.astype(o_ref.dtype)


# ----------------------------------------------------------------------------
# Wrappers
# ----------------------------------------------------------------------------
def conv_relu_pool(a, w_packed, b_packed, k):
    """Valid conv (stride 1) + ReLU + 2x2/2 max-pool on channel-major activations.

    a        : [Cin, B, H, W]   activations (CNHW)
    w_packed : [Cout, Cin*K*K]  (PyTorch [Cout,Cin,K,K] reshaped; (ci, kh, kw) ordering)
    b_packed : [Cout, 1]
    returns  : [Cout, B, Hp, Wp]
    """
    cin, batch, h, w = a.shape
    cout = w_packed.shape[0]
    ho, wo = h - k + 1, w - k + 1
    hp, wp = ho // 2, wo // 2
    n = batch * hp * wp
    ckk = cin * k * k

    # im2col built directly in the transposed layout and split into the four 2x2-pooling
    # phases, so the pool becomes an elementwise max inside the kernel (XLA glue only;
    # the contraction itself runs on the MXU).
    cols = []
    for kh in range(k):
        for kw in range(k):
            cols.append(a[:, :, kh:kh + ho, kw:kw + wo])            # [Cin, B, Ho, Wo]
    patches = jnp.stack(cols, axis=1).reshape(ckk, batch, ho, wo)   # (ci, kh, kw) major
    phases = [patches[:, :, dh::2, dw::2].reshape(ckk, n)
              for dh in (0, 1) for dw in (0, 1)]                    # 4 x [CKK, B*Hp*Wp]

    # Tile the flattened output-position (lane) dim; the contraction dim stays whole.
    tn = n if n <= 512 else 512
    grid = (pl.cdiv(n, tn),)
    patch_spec = pl.BlockSpec((ckk, tn), lambda i: (0, i))

    out = pl.pallas_call(
        _conv_relu_pool_kernel,
        out_shape=jax.ShapeDtypeStruct((cout, n), jnp.float32),
        grid=grid,
        in_specs=[patch_spec, patch_spec, patch_spec, patch_spec,
                  pl.BlockSpec((cout, ckk), lambda i: (0, 0)),
                  pl.BlockSpec((cout, 1), lambda i: (0, 0))],
        out_specs=pl.BlockSpec((cout, tn), lambda i: (0, i)),
        compiler_params=pltpu.CompilerParams(dimension_semantics=("parallel",)),
    )(*phases, w_packed, b_packed)
    return out.reshape(cout, batch, hp, wp)


def fc_stack(x, w1, b1, w2, b2, w3, b3):
    """Fused fc1(+ReLU) -> fc2(+ReLU) -> fc3.   x: [B, 400] -> [B, 10]."""
    batch = x.shape[0]
    tb = batch if batch <= 256 else 256
    grid = (pl.cdiv(batch, tb),)

    def rows(feat):
        return pl.BlockSpec((tb, feat), lambda i: (i, 0))

    def whole(arr):
        return pl.BlockSpec(arr.shape, lambda i: (0, 0))

    return pl.pallas_call(
        _fc_stack_kernel,
        out_shape=jax.ShapeDtypeStruct((batch, w3.shape[1]), jnp.float32),
        grid=grid,
        in_specs=[rows(x.shape[1]),
                  whole(w1), whole(b1), whole(w2), whole(b2), whole(w3), whole(b3)],
        out_specs=rows(w3.shape[1]),
        compiler_params=pltpu.CompilerParams(dimension_semantics=("parallel",)),
    )(x, w1, b1, w2, b2, w3, b3)


# ----------------------------------------------------------------------------
# Net: parameters + forward (mirrors the PyTorch module)
# ----------------------------------------------------------------------------
def init_params(key):
    """Parameters in PyTorch layout (Conv2d: [Cout,Cin,K,K], Linear: [out,in])."""
    ks = jax.random.split(key, 10)

    def uni(k, shape, fan_in):
        bound = 1.0 / jnp.sqrt(jnp.float32(fan_in))
        return jax.random.uniform(k, shape, jnp.float32, -bound, bound)

    return {
        "conv1_w": uni(ks[0], (6, 3, 5, 5), 3 * 25),
        "conv1_b": uni(ks[1], (6,), 3 * 25),
        "conv2_w": uni(ks[2], (16, 6, 5, 5), 6 * 25),
        "conv2_b": uni(ks[3], (16,), 6 * 25),
        "fc1_w": uni(ks[4], (120, 16 * 5 * 5), 16 * 5 * 5),
        "fc1_b": uni(ks[5], (120,), 16 * 5 * 5),
        "fc2_w": uni(ks[6], (84, 120), 120),
        "fc2_b": uni(ks[7], (84,), 120),
        "fc3_w": uni(ks[8], (10, 84), 84),
        "fc3_b": uni(ks[9], (10,), 84),
    }


def pack_params(p):
    """One-time packing: conv weights -> [Cout, Cin*K*K], FC weights -> [in, out]."""
    return {
        "conv1_w": p["conv1_w"].reshape(6, 3 * 25),
        "conv1_b": p["conv1_b"].reshape(6, 1),
        "conv2_w": p["conv2_w"].reshape(16, 6 * 25),
        "conv2_b": p["conv2_b"].reshape(16, 1),
        "fc1_w": p["fc1_w"].T, "fc1_b": p["fc1_b"].reshape(1, -1),
        "fc2_w": p["fc2_w"].T, "fc2_b": p["fc2_b"].reshape(1, -1),
        "fc3_w": p["fc3_w"].T, "fc3_b": p["fc3_b"].reshape(1, -1),
    }


def net_forward(packed, x):
    # x: [B, 3, 32, 32] NCHW (same as the PyTorch module)
    batch = x.shape[0]
    a = jnp.transpose(x, (1, 0, 2, 3))                                 # -> CNHW (tiny, once)
    a = conv_relu_pool(a, packed["conv1_w"], packed["conv1_b"], 5)     # [6, B, 14, 14]
    a = conv_relu_pool(a, packed["conv2_w"], packed["conv2_b"], 5)     # [16, B, 5, 5]
    xf = jnp.transpose(a, (1, 0, 2, 3)).reshape(batch, 16 * 5 * 5)     # == torch view(-1, 400)
    return fc_stack(xf, packed["fc1_w"], packed["fc1_b"],
                    packed["fc2_w"], packed["fc2_b"],
                    packed["fc3_w"], packed["fc3_b"])


def reference_forward(params, x):
    """Pure-JAX (non-Pallas) reference mirroring the PyTorch module."""
    def conv(x, w, b):
        y = jax.lax.conv_general_dilated(
            x, w, window_strides=(1, 1), padding="VALID",
            dimension_numbers=("NCHW", "OIHW", "NCHW"))
        return y + b.reshape(1, -1, 1, 1)

    def pool(x):
        b_, c, h, w = x.shape
        return jnp.max(x.reshape(b_, c, h // 2, 2, w // 2, 2), axis=(3, 5))

    x = pool(jax.nn.relu(conv(x, params["conv1_w"], params["conv1_b"])))
    x = pool(jax.nn.relu(conv(x, params["conv2_w"], params["conv2_b"])))
    x = x.reshape(-1, 16 * 5 * 5)
    x = jax.nn.relu(x @ params["fc1_w"].T + params["fc1_b"])
    x = jax.nn.relu(x @ params["fc2_w"].T + params["fc2_b"])
    return x @ params["fc3_w"].T + params["fc3_b"]


if __name__ == "__main__":
    key = jax.random.PRNGKey(0)
    pkey, xkey = jax.random.split(key)
    raw_params = init_params(pkey)
    packed = pack_params(raw_params)
    x = jax.random.normal(xkey, (2, 3, 32, 32), dtype=jnp.float32)

    out = jax.block_until_ready(jax.jit(net_forward)(packed, x))
    assert out.shape == (2, 10) and out.dtype == jnp.float32

    # Sanity check vs a pure-JAX reference (loose tol: MXU / XLA default f32 matmul
    # precisions can differ slightly; a real layout bug would be O(1) off).
    ref = jax.block_until_ready(jax.jit(reference_forward)(raw_params, x))
    err = float(jnp.max(jnp.abs(out - ref)))
    assert err < 1e-1, f"mismatch vs reference: max abs err = {err}"

    print("KERNEL_OK")
</pallas_src>

<mosaic_0001>
module attributes {stable_mosaic.version = 11 : i64} {
  func.func @_conv_relu_pool_kernel(%arg0: i32, %arg1: memref<75x392xf32, #tpu.memory_space<vmem>>, %arg2: memref<75x392xf32, #tpu.memory_space<vmem>>, %arg3: memref<75x392xf32, #tpu.memory_space<vmem>>, %arg4: memref<75x392xf32, #tpu.memory_space<vmem>>, %arg5: memref<6x75xf32, #tpu.memory_space<vmem>>, %arg6: memref<6x1xf32, #tpu.memory_space<vmem>>, %arg7: memref<6x392xf32, #tpu.memory_space<vmem>>) attributes {dimension_semantics = [#tpu.dimension_semantics<parallel>], iteration_bounds = array<i64: 1>, scalar_prefetch = 0 : i64, scratch_operands = 0 : i64, tpu.core_type = #tpu.core_type<tc>, window_params = [{transform_indices = @transform_0, window_bounds = array<i64: 75, 392>}, {transform_indices = @transform_1, window_bounds = array<i64: 75, 392>}, {transform_indices = @transform_2, window_bounds = array<i64: 75, 392>}, {transform_indices = @transform_3, window_bounds = array<i64: 75, 392>}, {pipeline_mode = #tpu.pipeline_mode<synchronous>, transform_indices = @transform_4, window_bounds = array<i64: 6, 75>}, {pipeline_mode = #tpu.pipeline_mode<synchronous>, transform_indices = @transform_5, window_bounds = array<i64: 6, 1>}, {transform_indices = @transform_6, window_bounds = array<i64: 6, 392>}]} {
    %c0 = arith.constant 0 : index
    %c0_0 = arith.constant 0 : index
    %0 = vector.load %arg5[%c0, %c0_0] : memref<6x75xf32, #tpu.memory_space<vmem>>, vector<6x75xf32>
    %c0_1 = arith.constant 0 : index
    %c0_2 = arith.constant 0 : index
    %1 = vector.load %arg1[%c0_1, %c0_2] : memref<75x392xf32, #tpu.memory_space<vmem>>, vector<75x392xf32>
    %cst = arith.constant dense<0.000000e+00> : vector<6x392xf32>
    %2 = tpu.matmul %0, %1, %cst {dimension_numbers = #tpu.dot_dimension_numbers<[1], [0], [0], [1], [0, 0, 1, 1], [], []>} : vector<6x75xf32>, vector<75x392xf32>, vector<6x392xf32> -> vector<6x392xf32>
    %c0_3 = arith.constant 0 : index
    %c0_4 = arith.constant 0 : index
    %3 = vector.load %arg2[%c0_3, %c0_4] : memref<75x392xf32, #tpu.memory_space<vmem>>, vector<75x392xf32>
    %cst_5 = arith.constant dense<0.000000e+00> : vector<6x392xf32>
    %4 = tpu.matmul %0, %3, %cst_5 {dimension_numbers = #tpu.dot_dimension_numbers<[1], [0], [0], [1], [0, 0, 1, 1], [], []>} : vector<6x75xf32>, vector<75x392xf32>, vector<6x392xf32> -> vector<6x392xf32>
    %5 = arith.maximumf %2, %4 : vector<6x392xf32>
    %c0_6 = arith.constant 0 : index
    %c0_7 = arith.constant 0 : index
    %6 = vector.load %arg3[%c0_6, %c0_7] : memref<75x392xf32, #tpu.memory_space<vmem>>, vector<75x392xf32>
    %cst_8 = arith.constant dense<0.000000e+00> : vector<6x392xf32>
    %7 = tpu.matmul %0, %6, %cst_8 {dimension_numbers = #tpu.dot_dimension_numbers<[1], [0], [0], [1], [0, 0, 1, 1], [], []>} : vector<6x75xf32>, vector<75x392xf32>, vector<6x392xf32> -> vector<6x392xf32>
    %8 = arith.maximumf %5, %7 : vector<6x392xf32>
    %c0_9 = arith.constant 0 : index
    %c0_10 = arith.constant 0 : index
    %9 = vector.load %arg4[%c0_9, %c0_10] : memref<75x392xf32, #tpu.memory_space<vmem>>, vector<75x392xf32>
    %cst_11 = arith.constant dense<0.000000e+00> : vector<6x392xf32>
    %10 = tpu.matmul %0, %9, %cst_11 {dimension_numbers = #tpu.dot_dimension_numbers<[1], [0], [0], [1], [0, 0, 1, 1], [], []>} : vector<6x75xf32>, vector<75x392xf32>, vector<6x392xf32> -> vector<6x392xf32>
    %11 = arith.maximumf %8, %10 : vector<6x392xf32>
    %c0_12 = arith.constant 0 : index
    %c0_13 = arith.constant 0 : index
    %12 = vector.load %arg6[%c0_12, %c0_13] : memref<6x1xf32, #tpu.memory_space<vmem>>, vector<6x1xf32>
    %13 = vector.broadcast %12 : vector<6x1xf32> to vector<6x392xf32>
    %14 = arith.addf %11, %13 : vector<6x392xf32>
    %cst_14 = arith.constant 0.000000e+00 : f32
    %15 = vector.broadcast %cst_14 : f32 to vector<6x392xf32>
    %16 = arith.maximumf %14, %15 : vector<6x392xf32>
    %c0_15 = arith.constant 0 : index
    %c0_16 = arith.constant 0 : index
    %17 = vector.load %arg7[%c0_15, %c0_16] : memref<6x392xf32, #tpu.memory_space<vmem>>, vector<6x392xf32>
    tpu.vector_store %arg7[%c0_15, %c0_16], %16 {strides = array<i32>} : memref<6x392xf32, #tpu.memory_space<vmem>>, vector<6x392xf32>,
    return
  }
  func.func @transform_0(%arg0: i32) -> (i32, i32) {
    %c0_i32 = arith.constant 0 : i32
    %c0_i32_0 = arith.constant 0 : i32
    return %c0_i32, %arg0 : i32, i32
  }
  func.func @transform_1(%arg0: i32) -> (i32, i32) {
    %c0_i32 = arith.constant 0 : i32
    %c0_i32_0 = arith.constant 0 : i32
    return %c0_i32, %arg0 : i32, i32
  }
  func.func @transform_2(%arg0: i32) -> (i32, i32) {
    %c0_i32 = arith.constant 0 : i32
    %c0_i32_0 = arith.constant 0 : i32
    return %c0_i32, %arg0 : i32, i32
  }
  func.func @transform_3(%arg0: i32) -> (i32, i32) {
    %c0_i32 = arith.constant 0 : i32
    %c0_i32_0 = arith.constant 0 : i32
    return %c0_i32, %arg0 : i32, i32
  }
  func.func @transform_4(%arg0: i32) -> (i32, i32) {
    %c0_i32 = arith.constant 0 : i32
    %c0_i32_0 = arith.constant 0 : i32
    %c0_i32_1 = arith.constant 0 : i32
    return %c0_i32, %c0_i32_0 : i32, i32
  }
  func.func @transform_5(%arg0: i32) -> (i32, i32) {
    %c0_i32 = arith.constant 0 : i32
    %c0_i32_0 = arith.constant 0 : i32
    %c0_i32_1 = arith.constant 0 : i32
    return %c0_i32, %c0_i32_0 : i32, i32
  }
  func.func @transform_6(%arg0: i32) -> (i32, i32) {
    %c0_i32 = arith.constant 0 : i32
    %c0_i32_0 = arith.constant 0 : i32
    return %c0_i32, %arg0 : i32, i32
  }
}

module attributes {stable_mosaic.version = 11 : i64} {
  func.func @_conv_relu_pool_kernel(%arg0: i32, %arg1: memref<150x50xf32, #tpu.memory_space<vmem>>, %arg2: memref<150x50xf32, #tpu.memory_space<vmem>>, %arg3: memref<150x50xf32, #tpu.memory_space<vmem>>, %arg4: memref<150x50xf32, #tpu.memory_space<vmem>>, %arg5: memref<16x150xf32, #tpu.memory_space<vmem>>, %arg6: memref<16x1xf32, #tpu.memory_space<vmem>>, %arg7: memref<16x50xf32, #tpu.memory_space<vmem>>) attributes {dimension_semantics = [#tpu.dimension_semantics<parallel>], iteration_bounds = array<i64: 1>, scalar_prefetch = 0 : i64, scratch_operands = 0 : i64, tpu.core_type = #tpu.core_type<tc>, window_params = [{transform_indices = @transform_0, window_bounds = array<i64: 150, 50>}, {transform_indices = @transform_1, window_bounds = array<i64: 150, 50>}, {transform_indices = @transform_2, window_bounds = array<i64: 150, 50>}, {transform_indices = @transform_3, window_bounds = array<i64: 150, 50>}, {pipeline_mode = #tpu.pipeline_mode<synchronous>, transform_indices = @transform_4, window_bounds = array<i64: 16, 150>}, {pipeline_mode = #tpu.pipeline_mode<synchronous>, transform_indices = @transform_5, window_bounds = array<i64: 16, 1>}, {transform_indices = @transform_6, window_bounds = array<i64: 16, 50>}]} {
    %c0 = arith.constant 0 : index
    %c0_0 = arith.constant 0 : index
    %0 = vector.load %arg5[%c0, %c0_0] : memref<16x150xf32, #tpu.memory_space<vmem>>, vector<16x150xf32>
    %c0_1 = arith.constant 0 : index
    %c0_2 = arith.constant 0 : index
    %1 = vector.load %arg1[%c0_1, %c0_2] : memref<150x50xf32, #tpu.memory_space<vmem>>, vector<150x50xf32>
    %cst = arith.constant dense<0.000000e+00> : vector<16x50xf32>
    %2 = tpu.matmul %0, %1, %cst {dimension_numbers = #tpu.dot_dimension_numbers<[1], [0], [0], [1], [0, 0, 1, 1], [], []>} : vector<16x150xf32>, vector<150x50xf32>, vector<16x50xf32> -> vector<16x50xf32>
    %c0_3 = arith.constant 0 : index
    %c0_4 = arith.constant 0 : index
    %3 = vector.load %arg2[%c0_3, %c0_4] : memref<150x50xf32, #tpu.memory_space<vmem>>, vector<150x50xf32>
    %cst_5 = arith.constant dense<0.000000e+00> : vector<16x50xf32>
    %4 = tpu.matmul %0, %3, %cst_5 {dimension_numbers = #tpu.dot_dimension_numbers<[1], [0], [0], [1], [0, 0, 1, 1], [], []>} : vector<16x150xf32>, vector<150x50xf32>, vector<16x50xf32> -> vector<16x50xf32>
    %5 = arith.maximumf %2, %4 : vector<16x50xf32>
    %c0_6 = arith.constant 0 : index
    %c0_7 = arith.constant 0 : index
    %6 = vector.load %arg3[%c0_6, %c0_7] : memref<150x50xf32, #tpu.memory_space<vmem>>, vector<150x50xf32>
    %cst_8 = arith.constant dense<0.000000e+00> : vector<16x50xf32>
    %7 = tpu.matmul %0, %6, %cst_8 {dimension_numbers = #tpu.dot_dimension_numbers<[1], [0], [0], [1], [0, 0, 1, 1], [], []>} : vector<16x150xf32>, vector<150x50xf32>, vector<16x50xf32> -> vector<16x50xf32>
    %8 = arith.maximumf %5, %7 : vector<16x50xf32>
    %c0_9 = arith.constant 0 : index
    %c0_10 = arith.constant 0 : index
    %9 = vector.load %arg4[%c0_9, %c0_10] : memref<150x50xf32, #tpu.memory_space<vmem>>, vector<150x50xf32>
    %cst_11 = arith.constant dense<0.000000e+00> : vector<16x50xf32>
    %10 = tpu.matmul %0, %9, %cst_11 {dimension_numbers = #tpu.dot_dimension_numbers<[1], [0], [0], [1], [0, 0, 1, 1], [], []>} : vector<16x150xf32>, vector<150x50xf32>, vector<16x50xf32> -> vector<16x50xf32>
    %11 = arith.maximumf %8, %10 : vector<16x50xf32>
    %c0_12 = arith.constant 0 : index
    %c0_13 = arith.constant 0 : index
    %12 = vector.load %arg6[%c0_12, %c0_13] : memref<16x1xf32, #tpu.memory_space<vmem>>, vector<16x1xf32>
    %13 = vector.broadcast %12 : vector<16x1xf32> to vector<16x50xf32>
    %14 = arith.addf %11, %13 : vector<16x50xf32>
    %cst_14 = arith.constant 0.000000e+00 : f32
    %15 = vector.broadcast %cst_14 : f32 to vector<16x50xf32>
    %16 = arith.maximumf %14, %15 : vector<16x50xf32>
    %c0_15 = arith.constant 0 : index
    %c0_16 = arith.constant 0 : index
    %17 = vector.load %arg7[%c0_15, %c0_16] : memref<16x50xf32, #tpu.memory_space<vmem>>, vector<16x50xf32>
    tpu.vector_store %arg7[%c0_15, %c0_16], %16 {strides = array<i32>} : memref<16x50xf32, #tpu.memory_space<vmem>>, vector<16x50xf32>,
    return
  }
  func.func @transform_0(%arg0: i32) -> (i32, i32) {
    %c0_i32 = arith.constant 0 : i32
    %c0_i32_0 = arith.constant 0 : i32
    return %c0_i32, %arg0 : i32, i32
  }
  func.func @transform_1(%arg0: i32) -> (i32, i32) {
    %c0_i32 = arith.constant 0 : i32
    %c0_i32_0 = arith.constant 0 : i32
    return %c0_i32, %arg0 : i32, i32
  }
  func.func @transform_2(%arg0: i32) -> (i32, i32) {
    %c0_i32 = arith.constant 0 : i32
    %c0_i32_0 = arith.constant 0 : i32
    return %c0_i32, %arg0 : i32, i32
  }
  func.func @transform_3(%arg0: i32) -> (i32, i32) {
    %c0_i32 = arith.constant 0 : i32
    %c0_i32_0 = arith.constant 0 : i32
    return %c0_i32, %arg0 : i32, i32
  }
  func.func @transform_4(%arg0: i32) -> (i32, i32) {
    %c0_i32 = arith.constant 0 : i32
    %c0_i32_0 = arith.constant 0 : i32
    %c0_i32_1 = arith.constant 0 : i32
    return %c0_i32, %c0_i32_0 : i32, i32
  }
  func.func @transform_5(%arg0: i32) -> (i32, i32) {
    %c0_i32 = arith.constant 0 : i32
    %c0_i32_0 = arith.constant 0 : i32
    %c0_i32_1 = arith.constant 0 : i32
    return %c0_i32, %c0_i32_0 : i32, i32
  }
  func.func @transform_6(%arg0: i32) -> (i32, i32) {
    %c0_i32 = arith.constant 0 : i32
    %c0_i32_0 = arith.constant 0 : i32
    return %c0_i32, %arg0 : i32, i32
  }
}

module attributes {stable_mosaic.version = 11 : i64} {
  func.func @_fc_stack_kernel(%arg0: i32, %arg1: memref<2x400xf32, #tpu.memory_space<vmem>>, %arg2: memref<400x120xf32, #tpu.memory_space<vmem>>, %arg3: memref<1x120xf32, #tpu.memory_space<vmem>>, %arg4: memref<120x84xf32, #tpu.memory_space<vmem>>, %arg5: memref<1x84xf32, #tpu.memory_space<vmem>>, %arg6: memref<84x10xf32, #tpu.memory_space<vmem>>, %arg7: memref<1x10xf32, #tpu.memory_space<vmem>>, %arg8: memref<2x10xf32, #tpu.memory_space<vmem>>) attributes {dimension_semantics = [#tpu.dimension_semantics<parallel>], iteration_bounds = array<i64: 1>, scalar_prefetch = 0 : i64, scratch_operands = 0 : i64, tpu.core_type = #tpu.core_type<tc>, window_params = [{transform_indices = @transform_0, window_bounds = array<i64: 2, 400>}, {pipeline_mode = #tpu.pipeline_mode<synchronous>, transform_indices = @transform_1, window_bounds = array<i64: 400, 120>}, {pipeline_mode = #tpu.pipeline_mode<synchronous>, transform_indices = @transform_2, window_bounds = array<i64: 1, 120>}, {pipeline_mode = #tpu.pipeline_mode<synchronous>, transform_indices = @transform_3, window_bounds = array<i64: 120, 84>}, {pipeline_mode = #tpu.pipeline_mode<synchronous>, transform_indices = @transform_4, window_bounds = array<i64: 1, 84>}, {pipeline_mode = #tpu.pipeline_mode<synchronous>, transform_indices = @transform_5, window_bounds = array<i64: 84, 10>}, {pipeline_mode = #tpu.pipeline_mode<synchronous>, transform_indices = @transform_6, window_bounds = array<i64: 1, 10>}, {transform_indices = @transform_7, window_bounds = array<i64: 2, 10>}]} {
    %c0 = arith.constant 0 : index
    %c0_0 = arith.constant 0 : index
    %0 = vector.load %arg1[%c0, %c0_0] : memref<2x400xf32, #tpu.memory_space<vmem>>, vector<2x400xf32>
    %c0_1 = arith.constant 0 : index
    %c0_2 = arith.constant 0 : index
    %1 = vector.load %arg2[%c0_1, %c0_2] : memref<400x120xf32, #tpu.memory_space<vmem>>, vector<400x120xf32>
    %cst = arith.constant dense<0.000000e+00> : vector<2x120xf32>
    %2 = tpu.matmul %0, %1, %cst {dimension_numbers = #tpu.dot_dimension_numbers<[1], [0], [0], [1], [0, 0, 1, 1], [], []>} : vector<2x400xf32>, vector<400x120xf32>, vector<2x120xf32> -> vector<2x120xf32>
    %c0_3 = arith.constant 0 : index
    %c0_4 = arith.constant 0 : index
    %3 = vector.load %arg3[%c0_3, %c0_4] : memref<1x120xf32, #tpu.memory_space<vmem>>, vector<1x120xf32>
    %4 = vector.broadcast %3 : vector<1x120xf32> to vector<2x120xf32>
    %5 = arith.addf %2, %4 : vector<2x120xf32>
    %cst_5 = arith.constant 0.000000e+00 : f32
    %6 = vector.broadcast %cst_5 : f32 to vector<2x120xf32>
    %7 = arith.maximumf %5, %6 : vector<2x120xf32>
    %c0_6 = arith.constant 0 : index
    %c0_7 = arith.constant 0 : index
    %8 = vector.load %arg4[%c0_6, %c0_7] : memref<120x84xf32, #tpu.memory_space<vmem>>, vector<120x84xf32>
    %cst_8 = arith.constant dense<0.000000e+00> : vector<2x84xf32>
    %9 = tpu.matmul %7, %8, %cst_8 {dimension_numbers = #tpu.dot_dimension_numbers<[1], [0], [0], [1], [0, 0, 1, 1], [], []>} : vector<2x120xf32>, vector<120x84xf32>, vector<2x84xf32> -> vector<2x84xf32>
    %c0_9 = arith.constant 0 : index
    %c0_10 = arith.constant 0 : index
    %10 = vector.load %arg5[%c0_9, %c0_10] : memref<1x84xf32, #tpu.memory_space<vmem>>, vector<1x84xf32>
    %11 = vector.broadcast %10 : vector<1x84xf32> to vector<2x84xf32>
    %12 = arith.addf %9, %11 : vector<2x84xf32>
    %cst_11 = arith.constant 0.000000e+00 : f32
    %13 = vector.broadcast %cst_11 : f32 to vector<2x84xf32>
    %14 = arith.maximumf %12, %13 : vector<2x84xf32>
    %c0_12 = arith.constant 0 : index
    %c0_13 = arith.constant 0 : index
    %15 = vector.load %arg6[%c0_12, %c0_13] : memref<84x10xf32, #tpu.memory_space<vmem>>, vector<84x10xf32>
    %cst_14 = arith.constant dense<0.000000e+00> : vector<2x10xf32>
    %16 = tpu.matmul %14, %15, %cst_14 {dimension_numbers = #tpu.dot_dimension_numbers<[1], [0], [0], [1], [0, 0, 1, 1], [], []>} : vector<2x84xf32>, vector<84x10xf32>, vector<2x10xf32> -> vector<2x10xf32>
    %c0_15 = arith.constant 0 : index
    %c0_16 = arith.constant 0 : index
    %17 = vector.load %arg7[%c0_15, %c0_16] : memref<1x10xf32, #tpu.memory_space<vmem>>, vector<1x10xf32>
    %18 = vector.broadcast %17 : vector<1x10xf32> to vector<2x10xf32>
    %19 = arith.addf %16, %18 : vector<2x10xf32>
    %c0_17 = arith.constant 0 : index
    %c0_18 = arith.constant 0 : index
    %20 = vector.load %arg8[%c0_17, %c0_18] : memref<2x10xf32, #tpu.memory_space<vmem>>, vector<2x10xf32>
    tpu.vector_store %arg8[%c0_17, %c0_18], %19 {strides = array<i32>} : memref<2x10xf32, #tpu.memory_space<vmem>>, vector<2x10xf32>,
    return
  }
  func.func @transform_0(%arg0: i32) -> (i32, i32) {
    %c0_i32 = arith.constant 0 : i32
    %c0_i32_0 = arith.constant 0 : i32
    return %arg0, %c0_i32 : i32, i32
  }
  func.func @transform_1(%arg0: i32) -> (i32, i32) {
    %c0_i32 = arith.constant 0 : i32
    %c0_i32_0 = arith.constant 0 : i32
    %c0_i32_1 = arith.constant 0 : i32
    return %c0_i32, %c0_i32_0 : i32, i32
  }
  func.func @transform_2(%arg0: i32) -> (i32, i32) {
    %c0_i32 = arith.constant 0 : i32
    %c0_i32_0 = arith.constant 0 : i32
    %c0_i32_1 = arith.constant 0 : i32
    return %c0_i32, %c0_i32_0 : i32, i32
  }
  func.func @transform_3(%arg0: i32) -> (i32, i32) {
    %c0_i32 = arith.constant 0 : i32
    %c0_i32_0 = arith.constant 0 : i32
    %c0_i32_1 = arith.constant 0 : i32
    return %c0_i32, %c0_i32_0 : i32, i32
  }
  func.func @transform_4(%arg0: i32) -> (i32, i32) {
    %c0_i32 = arith.constant 0 : i32
    %c0_i32_0 = arith.constant 0 : i32
    %c0_i32_1 = arith.constant 0 : i32
    return %c0_i32, %c0_i32_0 : i32, i32
  }
  func.func @transform_5(%arg0: i32) -> (i32, i32) {
    %c0_i32 = arith.constant 0 : i32
    %c0_i32_0 = arith.constant 0 : i32
    %c0_i32_1 = arith.constant 0 : i32
    return %c0_i32, %c0_i32_0 : i32, i32
  }
  func.func @transform_6(%arg0: i32) -> (i32, i32) {
    %c0_i32 = arith.constant 0 : i32
    %c0_i32_0 = arith.constant 0 : i32
    %c0_i32_1 = arith.constant 0 : i32
    return %c0_i32, %c0_i32_0 : i32, i32
  }
  func.func @transform_7(%arg0: i32) -> (i32, i32) {
    %c0_i32 = arith.constant 0 : i32
    %c0_i32_0 = arith.constant 0 : i32
    return %arg0, %c0_i32 : i32, i32
  }
}

</mosaic_0001>

<bundles_post_ra>
// kernel: net_forward.3
= control target key start
LH: loop header
LB: loop body
LE: loop exit
PB: predicated region body
PF: predicated region fallthrough
CT: control target
= control target key end

     0   :  { %v1044_v3 = vmov 0.0   ;;  %v1045_v8 = vmov 0   ;;  %vm68_vm0 = vcmask 1042432   ;;  %vm1046_vm1 = vmmov 1   ;;  %s1642_s0 = inlined_call_operand.vmem [shape: f32[75,392], index: 0, kind: input, shape index: {}]   ;;  %s1643_s1 = inlined_call_operand.vmem [shape: f32[75,392], index: 1, kind: input, shape index: {}]   ;;  %s1644_s4 = inlined_call_operand.vmem [shape: f32[6,75], index: 4, kind: input, shape index: {}]   ;;  %s1645_s2 = inlined_call_operand.vmem [shape: f32[75,392], index: 2, kind: input, shape index: {}]   ;;  %s1646_s3 = inlined_call_operand.vmem [shape: f32[75,392], index: 3, kind: input, shape index: {}]   ;;  %s1647_s5 = inlined_call_operand.vmem [shape: f32[6,1], index: 5, kind: input, shape index: {}]   ;;  %s1648_s6 = inlined_call_operand.vmem [shape: f32[6,392], index: 6, kind: output, shape index: {}]  }
   0x1   :  { %v25_v0 = vld [vmem:[%s1642_s0 + $0x8] sm:$0xff]  ;;  %v27_v2 = vld [vmem:[%s1642_s0 + $0x18] sm:$0xff]  ;;  %145 = vmatprep.mubr.f32.mxu0 %v1044_v3  ;;  %216 = vmatprep.mubr.f32.mxu1 %v1044_v3  ;;  %v24_v6 = vld [vmem:[%s1642_s0] sm:$0xff]  ;;  %vm64_vm3 = vcmask 613376   ;;  %vm834_vm4 = vcmask 62464  }
   0x2   :  { %v29_v1 = vld [vmem:[%s1642_s0 + $0x28] sm:$0xff]  ;;  %v31_v5 = vld [vmem:[%s1642_s0 + $0x38] sm:$0xff]  ;;  %v28_v7 = vld [vmem:[%s1642_s0 + $0x20] sm:$0xff]  ;;  %1043 = vset.pattern.permute.xlu0 %v1045_v8 }
   0x3   :  { %v864_v4 = vpack.c.bf16 %v29_v1, %v25_v0  ;;  %v886_v9 = vpack.c.bf16 %v31_v5, %v27_v2  ;;  %v866_v10 = vpack.c.bf16 %v28_v7, %v24_v6  ;;  %v26_v11 = vld [vmem:[%s1642_s0 + $0x10] sm:$0xff]  ;;  %v33_v13 = vld [vmem:[%s1642_s0 + $0x48] sm:$0xff]  ;;  %v35_v16 = vld [vmem:[%s1642_s0 + $0x58] sm:$0xff] }
   0x4   :  { %v30_v12 = vld [vmem:[%s1642_s0 + $0x30] sm:$0xff]  ;;  %v37_v15 = vld [vmem:[%s1642_s0 + $0x68] sm:$0xff]  ;;  %v39_v17 = vld [vmem:[%s1642_s0 + $0x78] sm:$0xff] }
   0x5   :  { %865 = vmatprep.subr.bf16.mxu0 %v864_v4  ;;  %v888_v14 = vpack.c.bf16 %v30_v12, %v26_v11  ;;  %887 = vmatprep.subr.bf16.mxu1 %v886_v9  ;;  %v868_v18 = vpack.c.bf16 %v37_v15, %v33_v13  ;;  %v890_v19 = vpack.c.bf16 %v39_v17, %v35_v16  ;;  %v32_v20 = vld [vmem:[%s1642_s0 + $0x40] sm:$0xff]  ;;  %v34_v22 = vld [vmem:[%s1642_s0 + $0x50] sm:$0xff]  ;;  %v41_v25 = vld [vmem:[%s1642_s0 + $0x88] sm:$0xff] }
   0x6   :  { %867 = vmatpush1.bf16.msra.mxu0 %v866_v10  ;;  %v36_v21 = vld [vmem:[%s1642_s0 + $0x60] sm:$0xff]  ;;  %v38_v24 = vld [vmem:[%s1642_s0 + $0x70] sm:$0xff]  ;;  %v45_v26 = vld [vmem:[%s1642_s0 + $0xa8] sm:$0xff] }
   0x7   :  { %889 = vmatpush1.bf16.msra.mxu1 %v888_v14  ;;  %v870_v23 = vpack.c.bf16 %v36_v21, %v32_v20  ;;  %869 = vmatprep.subr.bf16.mxu0 %v868_v18  ;;  %v892_v27 = vpack.c.bf16 %v38_v24, %v34_v22  ;;  %v872_v28 = vpack.c.bf16 %v45_v26, %v41_v25  ;;  %v43_v29 = vld [vmem:[%s1642_s0 + $0x98] sm:$0xff]  ;;  %v40_v31 = vld [vmem:[%s1642_s0 + $0x80] sm:$0xff]  ;;  %v42_v34 = vld [vmem:[%s1642_s0 + $0x90] sm:$0xff] }
   0x8   :  { %891 = vmatprep.subr.bf16.mxu1 %v890_v19  ;;  %v47_v30 = vld [vmem:[%s1642_s0 + $0xb8] sm:$0xff]  ;;  %v44_v33 = vld [vmem:[%s1642_s0 + $0xa0] sm:$0xff]  ;;  %v46_v35 = vld [vmem:[%s1642_s0 + $0xb0] sm:$0xff] }
   0x9   :  { %v894_v32 = vpack.c.bf16 %v47_v30, %v43_v29  ;;  %v874_v36 = vpack.c.bf16 %v44_v33, %v40_v31  ;;  %v49_v37 = vld [vmem:[%s1642_s0 + $0xc8] sm:$0xff]  ;;  %v51_v39 = vld [vmem:[%s1642_s0 + $0xd8] sm:$0xff]  ;;  %v896_v40 = vpack.c.bf16 %v46_v35, %v42_v34  ;;  %v48_v43 = vld [vmem:[%s1642_s0 + $0xc0] sm:$0xff] }
   0xa   :  { %871 = vmatpush1.bf16.msra.mxu0 %v870_v23  ;;  %v53_v38 = vld [vmem:[%s1642_s0 + $0xe8] sm:$0xff]  ;;  %v55_v42 = vld [vmem:[%s1642_s0 + $0xf8] sm:$0xff]  ;;  %v52_v44 = vld [vmem:[%s1642_s0 + $0xe0] sm:$0xff] }
   0xb   :  { %893 = vmatpush1.bf16.msra.mxu1 %v892_v27  ;;  %873 = vmatprep.subr.bf16.mxu0 %v872_v28  ;;  %v876_v41 = vpack.c.bf16 %v53_v38, %v49_v37  ;;  %v898_v45 = vpack.c.bf16 %v55_v42, %v51_v39  ;;  %v50_v46 = vld [vmem:[%s1642_s0 + $0xd0] sm:$0xff]  ;;  %v57_v48 = vld [vmem:[%s1642_s0 + $0x108] sm:$0xff]  ;;  %v59_v50 = vld [vmem:[%s1642_s0 + $0x118] sm:$0xff]  ;;  %v878_v51 = vpack.c.bf16 %v52_v44, %v48_v43 }
   0xc   :  { %895 = vmatprep.subr.bf16.mxu1 %v894_v32  ;;  %v54_v47 = vld [vmem:[%s1642_s0 + $0xf0] sm:$0xff]  ;;  %v61_v49 = vld [vmem:[%s1642_s0 + $0x128] sm:$0x7]  ;;  %vm1189_vm2 = vmpackc.low %vm68_vm0, %vm1046_vm1 }
   0xd   :  { %v63_v53 = vld [vmem:[%s1642_s0 + $0x138] sm:$0x7]  ;;  %v900_v54 = vpack.c.bf16 %v54_v47, %v50_v46  ;;  %v880_v55 = vpack.c.bf16 %v61_v49, %v57_v48  ;;  %v56_v56 = vld [vmem:[%s1642_s0 + $0x100] sm:$0xff]  ;;  %v58_v58 = vld [vmem:[%s1642_s0 + $0x110] sm:$0xff] }
   0xe   :  { %875 = vmatpush1.bf16.msra.mxu0 %v874_v36  ;;  %v60_v57 = vld [vmem:[%s1642_s0 + $0x120] sm:$0x7]  ;;  %v902_v59 = vpack.c.bf16 %v63_v53, %v59_v50  ;;  %v62_v60 = vld [vmem:[%s1642_s0 + $0x130] sm:$0x7]  ;;  %v224_v61 = vld [vmem:[%s1643_s1 + $0x8] sm:$0xff] }
   0xf   :  { %897 = vmatpush1.bf16.msra.mxu1 %v896_v40  ;;  %877 = vmatprep.subr.bf16.mxu0 %v876_v41  ;;  %v228_v62 = vld [vmem:[%s1643_s1 + $0x28] sm:$0xff]  ;;  %v226_v63 = vld [vmem:[%s1643_s1 + $0x18] sm:$0xff]  ;;  %v883_v1 = vpack.c.bf16 %v60_v57, %v56_v56  ;;  %v905_v2 = vpack.c.bf16 %v62_v60, %v58_v58  ;;  %v223_v5 = vld [vmem:[%s1643_s1] sm:$0xff] }
  0x10   :  { %899 = vmatprep.subr.bf16.mxu1 %v898_v45  ;;  %v230_v0 = vld [vmem:[%s1643_s1 + $0x38] sm:$0xff]  ;;  %v908_v4 = vpack.c.bf16 %v228_v62, %v224_v61  ;;  %v227_v6 = vld [vmem:[%s1643_s1 + $0x20] sm:$0xff]  ;;  %v225_v7 = vld [vmem:[%s1643_s1 + $0x10] sm:$0xff] }
  0x11   :  { %v930_v8 = vpack.c.bf16 %v230_v0, %v226_v63  ;;  %v229_v9 = vld [vmem:[%s1643_s1 + $0x30] sm:$0xff]  ;;  %v232_v10 = vld [vmem:[%s1643_s1 + $0x48] sm:$0xff]  ;;  %v234_v12 = vld [vmem:[%s1643_s1 + $0x58] sm:$0xff]  ;;  %v910_v15 = vpack.c.bf16 %v227_v6, %v223_v5 }
  0x12   :  { %879 = vmatpush1.bf16.msra.mxu0 %v878_v51  ;;  %v236_v11 = vld [vmem:[%s1643_s1 + $0x68] sm:$0xff]  ;;  %v238_v13 = vld [vmem:[%s1643_s1 + $0x78] sm:$0xff]  ;;  %v1253_v14 = vld [vmem:[%s1644_s4] sm:$0x3f]  ;;  %v932_v16 = vpack.c.bf16 %v229_v9, %v225_v7 }
  0x13   :  { %901 = vmatpush1.bf16.msra.mxu1 %v900_v54  ;;  %882 = vmatprep.subr.msk.bf16.mxu0 %vm1189_vm2, %v880_v55  ;;  %v912_v17 = vpack.c.bf16 %v236_v11, %v232_v10  ;;  %v231_v18 = vld [vmem:[%s1643_s1 + $0x40] sm:$0xff]  ;;  %v233_v20 = vld [vmem:[%s1643_s1 + $0x50] sm:$0xff]  ;;  %v934_v21 = vpack.c.bf16 %v238_v13, %v234_v12  ;;  %v240_v23 = vld [vmem:[%s1643_s1 + $0x88] sm:$0xff] }
  0x14   :  { %904 = vmatprep.subr.msk.bf16.mxu1 %vm1189_vm2, %v902_v59  ;;  %v235_v19 = vld [vmem:[%s1643_s1 + $0x60] sm:$0xff]  ;;  %v237_v22 = vld [vmem:[%s1643_s1 + $0x70] sm:$0xff]  ;;  %v244_v24 = vld [vmem:[%s1643_s1 + $0xa8] sm:$0xff] }
  0x15   :  { %v242_v25 = vld [vmem:[%s1643_s1 + $0x98] sm:$0xff]  ;;  %v914_v27 = vpack.c.bf16 %v235_v19, %v231_v18  ;;  %v936_v28 = vpack.c.bf16 %v237_v22, %v233_v20  ;;  %v916_v29 = vpack.c.bf16 %v244_v24, %v240_v23  ;;  %v239_v30 = vld [vmem:[%s1643_s1 + $0x80] sm:$0xff]  ;;  %v241_v32 = vld [vmem:[%s1643_s1 + $0x90] sm:$0xff] }
  0x16   :  { %885 = vmatpush1.bf16.msk.msra.mxu0 %vm1189_vm2, %v883_v1  ;;  %v246_v26 = vld [vmem:[%s1643_s1 + $0xb8] sm:$0xff]  ;;  %v243_v31 = vld [vmem:[%s1643_s1 + $0xa0] sm:$0xff]  ;;  %v245_v34 = vld [vmem:[%s1643_s1 + $0xb0] sm:$0xff] }
  0x17   :  { %907 = vmatpush1.bf16.msk.msra.mxu1 %vm1189_vm2, %v905_v2  ;;  %909 = vmatprep.subr.bf16.mxu0 %v908_v4  ;;  %v938_v33 = vpack.c.bf16 %v246_v26, %v242_v25  ;;  %v248_v35 = vld [vmem:[%s1643_s1 + $0xc8] sm:$0xff]  ;;  %v250_v37 = vld [vmem:[%s1643_s1 + $0xd8] sm:$0xff]  ;;  %v918_v39 = vpack.c.bf16 %v243_v31, %v239_v30  ;;  %v940_v40 = vpack.c.bf16 %v245_v34, %v241_v32  ;;  %v247_v42 = vld [vmem:[%s1643_s1 + $0xc0] sm:$0xff] }
  0x18   :  { %931 = vmatprep.subr.bf16.mxu1 %v930_v8  ;;  %v252_v36 = vld [vmem:[%s1643_s1 + $0xe8] sm:$0xff]  ;;  %v254_v38 = vld [vmem:[%s1643_s1 + $0xf8] sm:$0xff]  ;;  %v251_v43 = vld [vmem:[%s1643_s1 + $0xe0] sm:$0xff] }
  0x19   :  { %842 = vmatmul.mubr.msk.f32.vlgmr.msra.gmra.mrb[0].mxu0 %vm64_vm3, %v1253_v14  ;;  %v920_v41 = vpack.c.bf16 %v252_v36, %v248_v35  ;;  %v249_v44 = vld [vmem:[%s1643_s1 + $0xd0] sm:$0xff]  ;;  %v942_v45 = vpack.c.bf16 %v254_v38, %v250_v37  ;;  %v256_v47 = vld [vmem:[%s1643_s1 + $0x108] sm:$0xff]  ;;  %v258_v49 = vld [vmem:[%s1643_s1 + $0x118] sm:$0xff]  ;;  %v922_v51 = vpack.c.bf16 %v251_v43, %v247_v42 }
  0x1a   :  { %845 = vmatmul.mubr.msk.f32.vlgmr.msra.gmra.mrb[0].mxu1 %vm64_vm3, %v1253_v14  ;;  %911 = vmatpush1.bf16.msra.mxu0 %v910_v15  ;;  %v253_v46 = vld [vmem:[%s1643_s1 + $0xf0] sm:$0xff]  ;;  %v260_v48 = vld [vmem:[%s1643_s1 + $0x128] sm:$0x7]  ;;  %v262_v50 = vld [vmem:[%s1643_s1 + $0x138] sm:$0x7] }
  0x1b   :  { %933 = vmatpush1.bf16.msra.mxu1 %v932_v16  ;;  %913 = vmatprep.subr.bf16.mxu0 %v912_v17  ;;  %v944_v53 = vpack.c.bf16 %v253_v46, %v249_v44  ;;  %v924_v54 = vpack.c.bf16 %v260_v48, %v256_v47  ;;  %v255_v55 = vld [vmem:[%s1643_s1 + $0x100] sm:$0xff]  ;;  %v257_v57 = vld [vmem:[%s1643_s1 + $0x110] sm:$0xff]  ;;  %v946_v58 = vpack.c.bf16 %v262_v50, %v258_v49  ;;  %v422_v60 = vld [vmem:[%s1645_s2 + $0x8] sm:$0xff] }
  0x1c   :  { %935 = vmatprep.subr.bf16.mxu1 %v934_v21  ;;  %339 = vmatprep.mubr.f32.mxu0 %v1044_v3  ;;  %v259_v56 = vld [vmem:[%s1643_s1 + $0x120] sm:$0x7]  ;;  %v261_v59 = vld [vmem:[%s1643_s1 + $0x130] sm:$0x7]  ;;  %v426_v61 = vld [vmem:[%s1645_s2 + $0x28] sm:$0xff] }
  0x1d   :  { %410 = vmatprep.mubr.f32.mxu1 %v1044_v3  ;;  %v424_v62 = vld [vmem:[%s1645_s2 + $0x18] sm:$0xff]  ;;  %v927_v0 = vpack.c.bf16 %v259_v56, %v255_v55  ;;  %v949_v1 = vpack.c.bf16 %v261_v59, %v257_v57  ;;  %v952_v2 = vpack.c.bf16 %v426_v61, %v422_v60  ;;  %v421_v4 = vld [vmem:[%s1645_s2] sm:$0xff]  ;;  %v423_v6 = vld [vmem:[%s1645_s2 + $0x10] sm:$0xff] }
  0x1e   :  { %915 = vmatpush1.bf16.msra.mxu0 %v914_v27  ;;  %v428_v63 = vld [vmem:[%s1645_s2 + $0x38] sm:$0xff]  ;;  %v425_v5 = vld [vmem:[%s1645_s2 + $0x20] sm:$0xff]  ;;  %v427_v8 = vld [vmem:[%s1645_s2 + $0x30] sm:$0xff] }
  0x1f   :  { %937 = vmatpush1.bf16.msra.mxu1 %v936_v28  ;;  %917 = vmatprep.subr.bf16.mxu0 %v916_v29  ;;  %v974_v7 = vpack.c.bf16 %v428_v63, %v424_v62  ;;  %v430_v9 = vld [vmem:[%s1645_s2 + $0x48] sm:$0xff]  ;;  %v432_v11 = vld [vmem:[%s1645_s2 + $0x58] sm:$0xff]  ;;  %v954_v13 = vpack.c.bf16 %v425_v5, %v421_v4  ;;  %v976_v15 = vpack.c.bf16 %v427_v8, %v423_v6  ;;  %v429_v17 = vld [vmem:[%s1645_s2 + $0x40] sm:$0xff] }
  0x20   :  { %939 = vmatprep.subr.bf16.mxu1 %v938_v33  ;;  %v434_v10 = vld [vmem:[%s1645_s2 + $0x68] sm:$0xff]  ;;  %v436_v12 = vld [vmem:[%s1645_s2 + $0x78] sm:$0xff]  ;;  %v433_v18 = vld [vmem:[%s1645_s2 + $0x60] sm:$0xff] }
  0x21   :  { %v956_v16 = vpack.c.bf16 %v434_v10, %v430_v9  ;;  %v431_v19 = vld [vmem:[%s1645_s2 + $0x50] sm:$0xff]  ;;  %v978_v20 = vpack.c.bf16 %v436_v12, %v432_v11  ;;  %v438_v22 = vld [vmem:[%s1645_s2 + $0x88] sm:$0xff]  ;;  %v440_v24 = vld [vmem:[%s1645_s2 + $0x98] sm:$0xff]  ;;  %v958_v26 = vpack.c.bf16 %v433_v18, %v429_v17 }
  0x22   :  { %919 = vmatpush1.bf16.msra.mxu0 %v918_v39  ;;  %v435_v21 = vld [vmem:[%s1645_s2 + $0x70] sm:$0xff]  ;;  %v442_v23 = vld [vmem:[%s1645_s2 + $0xa8] sm:$0xff]  ;;  %v444_v25 = vld [vmem:[%s1645_s2 + $0xb8] sm:$0xff] }
  0x23   :  { %941 = vmatpush1.bf16.msra.mxu1 %v940_v40  ;;  %921 = vmatprep.subr.bf16.mxu0 %v920_v41  ;;  %v980_v27 = vpack.c.bf16 %v435_v21, %v431_v19  ;;  %v960_v28 = vpack.c.bf16 %v442_v23, %v438_v22  ;;  %v437_v29 = vld [vmem:[%s1645_s2 + $0x80] sm:$0xff]  ;;  %v439_v31 = vld [vmem:[%s1645_s2 + $0x90] sm:$0xff]  ;;  %v982_v32 = vpack.c.bf16 %v444_v25, %v440_v24  ;;  %v446_v34 = vld [vmem:[%s1645_s2 + $0xc8] sm:$0xff] }
  0x24   :  { %943 = vmatprep.subr.bf16.mxu1 %v942_v45  ;;  %v441_v30 = vld [vmem:[%s1645_s2 + $0xa0] sm:$0xff]  ;;  %v443_v33 = vld [vmem:[%s1645_s2 + $0xb0] sm:$0xff]  ;;  %v450_v35 = vld [vmem:[%s1645_s2 + $0xe8] sm:$0xff] }
  0x25   :  { %v448_v36 = vld [vmem:[%s1645_s2 + $0xd8] sm:$0xff]  ;;  %v962_v38 = vpack.c.bf16 %v441_v30, %v437_v29  ;;  %v984_v39 = vpack.c.bf16 %v443_v33, %v439_v31  ;;  %v964_v40 = vpack.c.bf16 %v450_v35, %v446_v34  ;;  %v445_v41 = vld [vmem:[%s1645_s2 + $0xc0] sm:$0xff]  ;;  %v447_v43 = vld [vmem:[%s1645_s2 + $0xd0] sm:$0xff] }
  0x26   :  { %923 = vmatpush1.bf16.msra.mxu0 %v922_v51  ;;  %v452_v37 = vld [vmem:[%s1645_s2 + $0xf8] sm:$0xff]  ;;  %v449_v42 = vld [vmem:[%s1645_s2 + $0xe0] sm:$0xff]  ;;  %v451_v45 = vld [vmem:[%s1645_s2 + $0xf0] sm:$0xff] }
  0x27   :  { %945 = vmatpush1.bf16.msra.mxu1 %v944_v53  ;;  %926 = vmatprep.subr.msk.bf16.mxu0 %vm1189_vm2, %v924_v54  ;;  %v986_v44 = vpack.c.bf16 %v452_v37, %v448_v36  ;;  %v454_v46 = vld [vmem:[%s1645_s2 + $0x108] sm:$0xff]  ;;  %v456_v48 = vld [vmem:[%s1645_s2 + $0x118] sm:$0xff]  ;;  %v966_v50 = vpack.c.bf16 %v449_v42, %v445_v41  ;;  %v453_v51 = vld [vmem:[%s1645_s2 + $0x100] sm:$0xff]  ;;  %v988_v53 = vpack.c.bf16 %v451_v45, %v447_v43 }
  0x28   :  { %948 = vmatprep.subr.msk.bf16.mxu1 %vm1189_vm2, %v946_v58  ;;  %v458_v47 = vld [vmem:[%s1645_s2 + $0x128] sm:$0x7]  ;;  %v460_v49 = vld [vmem:[%s1645_s2 + $0x138] sm:$0x7]  ;;  %v457_v55 = vld [vmem:[%s1645_s2 + $0x120] sm:$0x7] }
  0x29   :  { %v968_v54 = vpack.c.bf16 %v458_v47, %v454_v46  ;;  %v455_v56 = vld [vmem:[%s1645_s2 + $0x110] sm:$0xff]  ;;  %v990_v58 = vpack.c.bf16 %v460_v49, %v456_v48  ;;  %v620_v59 = vld [vmem:[%s1646_s3 + $0x8] sm:$0xff]  ;;  %v817_v61 = vld [vmem:[%s1647_s5] sm:$0x3f] }
  0x2a   :  { %929 = vmatpush1.bf16.msk.msra.mxu0 %vm1189_vm2, %v927_v0  ;;  %v459_v57 = vld [vmem:[%s1645_s2 + $0x130] sm:$0x7]  ;;  %v624_v60 = vld [vmem:[%s1646_s3 + $0x28] sm:$0xff]  ;;  %v622_v62 = vld [vmem:[%s1646_s3 + $0x18] sm:$0xff]  ;;  %820 = vperm.xlu0 %1043, %v817_v61   ;;  %v971_v0 = vpack.c.bf16 %v457_v55, %v453_v51 }
  0x2b   :  { %951 = vmatpush1.bf16.msk.msra.mxu1 %vm1189_vm2, %v949_v1  ;;  %953 = vmatprep.subr.bf16.mxu0 %v952_v2  ;;  %v626_v63 = vld [vmem:[%s1646_s3 + $0x38] sm:$0xff]  ;;  %v993_v1 = vpack.c.bf16 %v459_v57, %v455_v56  ;;  %v996_v2 = vpack.c.bf16 %v624_v60, %v620_v59  ;;  %v619_v4 = vld [vmem:[%s1646_s3] sm:$0xff]  ;;  %v621_v6 = vld [vmem:[%s1646_s3 + $0x10] sm:$0xff] }
  0x2c   :  { %975 = vmatprep.subr.bf16.mxu1 %v974_v7  ;;  %v623_v5 = vld [vmem:[%s1646_s3 + $0x20] sm:$0xff]  ;;  %v1018_v7 = vpack.c.bf16 %v626_v63, %v622_v62  ;;  %v625_v8 = vld [vmem:[%s1646_s3 + $0x30] sm:$0xff]  ;;  %v628_v9 = vld [vmem:[%s1646_s3 + $0x48] sm:$0xff] }
  0x2d   :  { %848 = vmatmul.mubr.msk.f32.vlgmr.msra.gmra.mrb[2].mxu0 %vm64_vm3, %v1253_v14  ;;  %v632_v10 = vld [vmem:[%s1646_s3 + $0x68] sm:$0xff]  ;;  %v630_v11 = vld [vmem:[%s1646_s3 + $0x58] sm:$0xff]  ;;  %v627_v17 = vld [vmem:[%s1646_s3 + $0x40] sm:$0xff] }
  0x2e   :  { %851 = vmatmul.mubr.msk.f32.vlgmr.msra.gmra.mrb[2].mxu1 %vm64_vm3, %v1253_v14  ;;  %955 = vmatpush1.bf16.msra.mxu0 %v954_v13  ;;  %v634_v12 = vld [vmem:[%s1646_s3 + $0x78] sm:$0xff]  ;;  %v998_v13 = vpack.c.bf16 %v623_v5, %v619_v4  ;;  %v631_v18 = vld [vmem:[%s1646_s3 + $0x60] sm:$0xff]  ;;  %v629_v19 = vld [vmem:[%s1646_s3 + $0x50] sm:$0xff] }
  0x2f   :  { %977 = vmatpush1.bf16.msra.mxu1 %v976_v15  ;;  %957 = vmatprep.subr.bf16.mxu0 %v956_v16  ;;  %v1020_v15 = vpack.c.bf16 %v625_v8, %v621_v6  ;;  %v1000_v16 = vpack.c.bf16 %v632_v10, %v628_v9  ;;  %v633_v21 = vld [vmem:[%s1646_s3 + $0x70] sm:$0xff]  ;;  %v636_v22 = vld [vmem:[%s1646_s3 + $0x88] sm:$0xff]  ;;  %v638_v24 = vld [vmem:[%s1646_s3 + $0x98] sm:$0xff] }
  0x30   :  { %979 = vmatprep.subr.bf16.mxu1 %v978_v20  ;;  %537 = vmatprep.mubr.f32.mxu0 %v1044_v3  ;;  %v1022_v20 = vpack.c.bf16 %v634_v12, %v630_v11  ;;  %v640_v23 = vld [vmem:[%s1646_s3 + $0xa8] sm:$0xff]  ;;  %v642_v25 = vld [vmem:[%s1646_s3 + $0xb8] sm:$0xff]  ;;  %v635_v29 = vld [vmem:[%s1646_s3 + $0x80] sm:$0xff] }
  0x31   :  { %608 = vmatprep.mubr.f32.mxu1 %v1044_v3  ;;  %v639_v30 = vld [vmem:[%s1646_s3 + $0xa0] sm:$0xff]  ;;  %v637_v31 = vld [vmem:[%s1646_s3 + $0x90] sm:$0xff]  ;;  %v644_v34 = vld [vmem:[%s1646_s3 + $0xc8] sm:$0xff] }
  0x32   :  { %959 = vmatpush1.bf16.msra.mxu0 %v958_v26  ;;  %v1002_v26 = vpack.c.bf16 %v631_v18, %v627_v17  ;;  %v641_v33 = vld [vmem:[%s1646_s3 + $0xb0] sm:$0xff]  ;;  %v648_v35 = vld [vmem:[%s1646_s3 + $0xe8] sm:$0xff]  ;;  %v646_v36 = vld [vmem:[%s1646_s3 + $0xd8] sm:$0xff] }
  0x33   :  { %981 = vmatpush1.bf16.msra.mxu1 %v980_v27  ;;  %961 = vmatprep.subr.bf16.mxu0 %v960_v28  ;;  %v1024_v27 = vpack.c.bf16 %v633_v21, %v629_v19  ;;  %v1004_v28 = vpack.c.bf16 %v640_v23, %v636_v22  ;;  %v650_v37 = vld [vmem:[%s1646_s3 + $0xf8] sm:$0xff]  ;;  %v643_v41 = vld [vmem:[%s1646_s3 + $0xc0] sm:$0xff]  ;;  %v645_v43 = vld [vmem:[%s1646_s3 + $0xd0] sm:$0xff] }
  0x34   :  { %983 = vmatprep.subr.bf16.mxu1 %v982_v32  ;;  %v1026_v32 = vpack.c.bf16 %v642_v25, %v638_v24  ;;  %v647_v42 = vld [vmem:[%s1646_s3 + $0xe0] sm:$0xff]  ;;  %v652_v45 = vld [vmem:[%s1646_s3 + $0x108] sm:$0xff]  ;;  %v654_v47 = vld [vmem:[%s1646_s3 + $0x118] sm:$0xff] }
  0x35   :  { %v656_v46 = vld [vmem:[%s1646_s3 + $0x128] sm:$0x7]  ;;  %v658_v48 = vld [vmem:[%s1646_s3 + $0x138] sm:$0x7]  ;;  %v1010_v49 = vpack.c.bf16 %v647_v42, %v643_v41  ;;  %v653_v56 = vld [vmem:[%s1646_s3 + $0x110] sm:$0xff] }
  0x36   :  { %963 = vmatpush1.bf16.msra.mxu0 %v962_v38  ;;  %v1006_v38 = vpack.c.bf16 %v639_v30, %v635_v29  ;;  %v1012_v51 = vpack.c.bf16 %v656_v46, %v652_v45  ;;  %v1034_v55 = vpack.c.bf16 %v658_v48, %v654_v47  ;;  %v657_v57 = vld [vmem:[%s1646_s3 + $0x130] sm:$0x7] }
  0x37   :  { %985 = vmatpush1.bf16.msra.mxu1 %v984_v39  ;;  %965 = vmatprep.subr.bf16.mxu0 %v964_v40  ;;  %v1028_v39 = vpack.c.bf16 %v641_v33, %v637_v31  ;;  %v1008_v40 = vpack.c.bf16 %v648_v35, %v644_v34  ;;  %v1037_v59 = vpack.c.bf16 %v657_v57, %v653_v56 }
  0x38   :  { %987 = vmatprep.subr.bf16.mxu1 %v986_v44  ;;  %v649_v44 = vld [vmem:[%s1646_s3 + $0xf0] sm:$0xff] }
  0x3a   :  { %967 = vmatpush1.bf16.msra.mxu0 %v966_v50  ;;  %v1032_v50 = vpack.c.bf16 %v649_v44, %v645_v43 }
  0x3b   :  { %989 = vmatpush1.bf16.msra.mxu1 %v988_v53  ;;  %970 = vmatprep.subr.msk.bf16.mxu0 %vm1189_vm2, %v968_v54  ;;  %v651_v53 = vld [vmem:[%s1646_s3 + $0x100] sm:$0xff] }
  0x3c   :  { %992 = vmatprep.subr.msk.bf16.mxu1 %vm1189_vm2, %v990_v58  ;;  %v655_v54 = vld [vmem:[%s1646_s3 + $0x120] sm:$0x7] }
  0x3d   :  { %v1015_v58 = vpack.c.bf16 %v655_v54, %v651_v53 }
  0x3e   :  { %973 = vmatpush1.bf16.msk.msra.mxu0 %vm1189_vm2, %v971_v0 }
  0x3f   :  { %995 = vmatpush1.bf16.msk.msra.mxu1 %vm1189_vm2, %v993_v1  ;;  %997 = vmatprep.subr.bf16.mxu0 %v996_v2 }
  0x40   :  { %1019 = vmatprep.subr.bf16.mxu1 %v1018_v7 }
  0x41   :  { %854 = vmatmul.mubr.msk.f32.vlgmr.msra.gmra.mrb[4].mxu0 %vm64_vm3, %v1253_v14 }
  0x42   :  { %857 = vmatmul.mubr.msk.f32.vlgmr.msra.gmra.mrb[4].mxu1 %vm64_vm3, %v1253_v14  ;;  %999 = vmatpush1.bf16.msra.mxu0 %v998_v13 }
  0x43   :  { %1021 = vmatpush1.bf16.msra.mxu1 %v1020_v15  ;;  %1001 = vmatprep.subr.bf16.mxu0 %v1000_v16 }
  0x44   :  { %1023 = vmatprep.subr.bf16.mxu1 %v1022_v20  ;;  %735 = vmatprep.mubr.f32.mxu0 %v1044_v3 }
  0x45   :  { %806 = vmatprep.mubr.f32.mxu1 %v1044_v3  ;;  %v1030_v3 = vpack.c.bf16 %v650_v37, %v646_v36 }
  0x46   :  { %1003 = vmatpush1.bf16.msra.mxu0 %v1002_v26 }
  0x47   :  { %1025 = vmatpush1.bf16.msra.mxu1 %v1024_v27  ;;  %1005 = vmatprep.subr.bf16.mxu0 %v1004_v28 }
  0x48   :  { %1027 = vmatprep.subr.bf16.mxu1 %v1026_v32 }
  0x4a   :  { %1007 = vmatpush1.bf16.msra.mxu0 %v1006_v38 }
  0x4b   :  { %1029 = vmatpush1.bf16.msra.mxu1 %v1028_v39  ;;  %1009 = vmatprep.subr.bf16.mxu0 %v1008_v40 }
  0x4c   :  { %1031 = vmatprep.subr.bf16.mxu1 %v1030_v3 }
  0x4e   :  { %1011 = vmatpush1.bf16.msra.mxu0 %v1010_v49 }
  0x4f   :  { %1033 = vmatpush1.bf16.msra.mxu1 %v1032_v50  ;;  %1014 = vmatprep.subr.msk.bf16.mxu0 %vm1189_vm2, %v1012_v51 }
  0x50   :  { %1036 = vmatprep.subr.msk.bf16.mxu1 %vm1189_vm2, %v1034_v55 }
  0x52   :  { %1017 = vmatpush1.bf16.msk.msra.mxu0 %vm1189_vm2, %v1015_v58 }
  0x53   :  { %1039 = vmatpush1.bf16.msk.msra.mxu1 %vm1189_vm2, %v1037_v59 }
  0x55   :  { %860 = vmatmul.mubr.msk.f32.vlgmr.msra.gmra.mrb[6].mxu0 %vm64_vm3, %v1253_v14 }
  0x56   :  { %863 = vmatmul.mubr.msk.f32.vlgmr.msra.gmra.mrb[6].mxu1 %vm64_vm3, %v1253_v14 }
  0xa9   :  { %v821_v17 = vpop.permute.xlu0 %820 }
  0xec   :  { %v147_v60 = vpop.f32.mrb[0].mxu0 }
  0xed   :  { %v218_v61 = vpop.f32.mrb[0].mxu1  ;;  %v149_v62 = vpop.f32.mrb[1].mxu0 }
  0xee   :  { %v220_v63 = vpop.f32.mrb[1].mxu1 }
 0x100   :  { %v341_v0 = vpop.f32.mrb[2].mxu0 }
 0x101   :  { %v417_v1 = vmax.f32 %v147_v60, %v341_v0  ;;  %v412_v2 = vpop.f32.mrb[2].mxu1  ;;  %v343_v4 = vpop.f32.mrb[3].mxu0 }
 0x102   :  { %v419_v5 = vmax.f32 %v218_v61, %v412_v2  ;;  %v418_v6 = vmax.f32 %v149_v62, %v343_v4  ;;  %v414_v7 = vpop.f32.mrb[3].mxu1 }
 0x103   :  { %v420_v8 = vmax.f32 %v220_v63, %v414_v7 }
 0x114   :  { %v539_v52 = vpop.f32.mrb[4].mxu0 }
 0x115   :  { %v615_v9 = vmax.f32 %v417_v1, %v539_v52  ;;  %v610_v10 = vpop.f32.mrb[4].mxu1  ;;  %v541_v11 = vpop.f32.mrb[5].mxu0 }
 0x116   :  { %v617_v12 = vmax.f32 %v419_v5, %v610_v10  ;;  %v616_v13 = vmax.f32 %v418_v6, %v541_v11  ;;  %v612_v15 = vpop.f32.mrb[5].mxu1 }
 0x117   :  { %v618_v14 = vmax.f32 %v420_v8, %v612_v15 }
 0x128   :  { %v737_v16 = vpop.f32.mrb[6].mxu0 }
 0x129   :  { %v813_v18 = vmax.f32 %v615_v9, %v737_v16  ;;  %v808_v19 = vpop.f32.mrb[6].mxu1  ;;  %v739_v20 = vpop.f32.mrb[7].mxu0 }
 0x12a   :  { %v815_v21 = vmax.f32 %v617_v12, %v808_v19  ;;  %v814_v22 = vmax.f32 %v616_v13, %v739_v20  ;;  %v810_v23 = vpop.f32.mrb[7].mxu1 }
 0x12b   :  { %v816_v24 = vmax.f32 %v618_v14, %v810_v23  ;;  %v823_v25 = vadd.f32 %v821_v17, %v813_v18 }
 0x12c   :  { %v824_v26 = vadd.f32 %v821_v17, %v814_v22  ;;  %v825_v27 = vadd.f32 %v821_v17, %v815_v21 }
 0x12d   :  { %v826_v28 = vadd.f32 %v821_v17, %v816_v24  ;;  %v827_v29 = vmax.f32 %v823_v25, 0.0 }
 0x12e   :  { %v828_v30 = vmax.f32 %v824_v26, 0.0  ;;  %v829_v31 = vmax.f32 %v825_v27, 0.0 }
 0x12f   :  { %v830_v32 = vmax.f32 %v826_v28, 0.0  ;;  %831 = vst [vmem:[%s1648_s6] sm:$0x3f] %v827_v29 }
 0x130   :  { %832 = vst [vmem:[%s1648_s6 + $0x8] sm:$0x3f] %v828_v30  ;;  %833 = vst [vmem:[%s1648_s6 + $0x10] sm:$0x3f] %v829_v31 }
 0x131   :  { %835 = vst.msk [vmem:[%s1648_s6 + $0x18] sm:$0x3f] %vm834_vm4, %v830_v32 }

// kernel: net_forward.4
= control target key start
LH: loop header
LB: loop body
LE: loop exit
PB: predicated region body
PF: predicated region fallthrough
CT: control target
= control target key end

     0   :  { %v576_v0 = vmov 0.0|0.0   ;;  %v577_v8 = vmov 0   ;;  %vm46_vm0 = vcmask 179200   ;;  %v578_v61 = vmov 0.0   ;;  %s942_s0 = inlined_call_operand.vmem [shape: f32[150,50], index: 0, kind: input, shape index: {}]   ;;  %s943_s1 = inlined_call_operand.vmem [shape: f32[150,50], index: 1, kind: input, shape index: {}]   ;;  %s944_s4 = inlined_call_operand.vmem [shape: f32[16,150], index: 4, kind: input, shape index: {}]   ;;  %s945_s5 = inlined_call_operand.vmem [shape: f32[16,1], index: 5, kind: input, shape index: {}]   ;;  %s946_s2 = inlined_call_operand.vmem [shape: f32[150,50], index: 2, kind: input, shape index: {}]   ;;  %s947_s3 = inlined_call_operand.vmem [shape: f32[150,50], index: 3, kind: input, shape index: {}]   ;;  %s948_s6 = inlined_call_operand.vmem [shape: f32[16,50], index: 6, kind: output, shape index: {}]  }
   0x1   :  { %464 = vmatprep.subr.bf16.mxu0 %v576_v0  ;;  %v27_v1 = vld [vmem:[%s942_s0] sm:$0xff]  ;;  %v28_v2 = vld [vmem:[%s942_s0 + $0x8] sm:$0xff]  ;;  %491 = vmatprep.subr.bf16.mxu1 %v576_v0  ;;  %v29_v6 = vld [vmem:[%s942_s0 + $0x10] sm:$0xff]  ;;  %vm53_vm1 = vcmask 1045504   ;;  %vm445_vm2 = vcmask 408576  }
   0x2   :  { %v132_v3 = vld [vmem:[%s943_s1] sm:$0xff]  ;;  %v465_v4 = vpack.c.bf16 %v28_v2, %v27_v1  ;;  %v133_v5 = vld [vmem:[%s943_s1 + $0x8] sm:$0xff]  ;;  %v30_v7 = vld [vmem:[%s942_s0 + $0x18] sm:$0xff]  ;;  %575 = vset.pattern.permute.xlu0 %v577_v8 }
   0x3   :  { %v492_v9 = vpack.c.bf16 %v133_v5, %v132_v3  ;;  %v134_v10 = vld [vmem:[%s943_s1 + $0x10] sm:$0xff]  ;;  %v135_v11 = vld [vmem:[%s943_s1 + $0x18] sm:$0xff]  ;;  %v468_v12 = vpack.c.bf16 %v30_v7, %v29_v6  ;;  %v31_v14 = vld [vmem:[%s942_s0 + $0x20] sm:$0xff] }
   0x4   :  { %466 = vmatpush1.bf16.msra.mxu0 %v465_v4  ;;  %v495_v13 = vpack.c.bf16 %v135_v11, %v134_v10  ;;  %v32_v15 = vld [vmem:[%s942_s0 + $0x28] sm:$0xff]  ;;  %v136_v16 = vld [vmem:[%s943_s1 + $0x20] sm:$0xff]  ;;  %v33_v20 = vld [vmem:[%s942_s0 + $0x30] sm:$0xff] }
   0x5   :  { %493 = vmatpush1.bf16.msra.mxu1 %v492_v9  ;;  %467 = vmatprep.subr.bf16.mxu0 %v576_v0  ;;  %v137_v17 = vld [vmem:[%s943_s1 + $0x28] sm:$0xff]  ;;  %v471_v18 = vpack.c.bf16 %v32_v15, %v31_v14  ;;  %v34_v21 = vld [vmem:[%s942_s0 + $0x38] sm:$0xff]  ;;  %v138_v22 = vld [vmem:[%s943_s1 + $0x30] sm:$0xff] }
   0x6   :  { %494 = vmatprep.subr.bf16.mxu1 %v576_v0  ;;  %v498_v19 = vpack.c.bf16 %v137_v17, %v136_v16  ;;  %v139_v23 = vld [vmem:[%s943_s1 + $0x38] sm:$0xff]  ;;  %v474_v24 = vpack.c.bf16 %v34_v21, %v33_v20  ;;  %v35_v26 = vld [vmem:[%s942_s0 + $0x40] sm:$0xff]  ;;  %v36_v27 = vld [vmem:[%s942_s0 + $0x48] sm:$0xff] }
   0x7   :  { %v501_v25 = vpack.c.bf16 %v139_v23, %v138_v22  ;;  %v678_v28 = vld [vmem:[%s944_s4 + $0x8] sm:$0xff]  ;;  %v140_v29 = vld [vmem:[%s943_s1 + $0x40] sm:$0xff]  ;;  %v477_v31 = vpack.c.bf16 %v36_v27, %v35_v26  ;;  %v37_v33 = vld [vmem:[%s942_s0 + $0x50] sm:$0xff] }
   0x8   :  { %469 = vmatpush1.bf16.msra.mxu0 %v468_v12  ;;  %v141_v30 = vld [vmem:[%s943_s1 + $0x48] sm:$0xff]  ;;  %453 = vmatprep.mubr.msk.f32.mxu0 %vm46_vm0, %v678_v28  ;;  %v38_v34 = vld [vmem:[%s942_s0 + $0x58] sm:$0xff]  ;;  %v142_v35 = vld [vmem:[%s943_s1 + $0x50] sm:$0xff] }
   0x9   :  { %496 = vmatpush1.bf16.msra.mxu1 %v495_v13  ;;  %470 = vmatprep.subr.bf16.mxu0 %v576_v0  ;;  %v504_v32 = vpack.c.bf16 %v141_v30, %v140_v29  ;;  %v143_v36 = vld [vmem:[%s943_s1 + $0x58] sm:$0xff]  ;;  %v480_v37 = vpack.c.bf16 %v38_v34, %v37_v33  ;;  %v39_v39 = vld [vmem:[%s942_s0 + $0x60] sm:$0xff]  ;;  %v40_v40 = vld [vmem:[%s942_s0 + $0x68] sm:$0xff] }
   0xa   :  { %497 = vmatprep.subr.bf16.mxu1 %v576_v0  ;;  %456 = vmatprep.mubr.msk.f32.mxu1 %vm46_vm0, %v678_v28  ;;  %v507_v38 = vpack.c.bf16 %v143_v36, %v142_v35  ;;  %v144_v41 = vld [vmem:[%s943_s1 + $0x60] sm:$0xff]  ;;  %v145_v42 = vld [vmem:[%s943_s1 + $0x68] sm:$0xff]  ;;  %v483_v43 = vpack.c.bf16 %v40_v40, %v39_v39  ;;  %v41_v45 = vld [vmem:[%s942_s0 + $0x70] sm:$0xff] }
   0xb   :  { %v510_v44 = vpack.c.bf16 %v145_v42, %v144_v41  ;;  %v42_v46 = vld [vmem:[%s942_s0 + $0x78] sm:$0xff]  ;;  %v146_v47 = vld [vmem:[%s943_s1 + $0x70] sm:$0xff]  ;;  %v429_v49 = vld [vmem:[%s945_s5] sm:$0xff] }
   0xc   :  { %472 = vmatpush1.bf16.msra.mxu0 %v471_v18  ;;  %v147_v48 = vld [vmem:[%s943_s1 + $0x78] sm:$0xff]  ;;  %v486_v50 = vpack.c.bf16 %v42_v46, %v41_v45  ;;  %433 = vperm.xlu0 %575, %v429_v49   ;;  %v43_v52 = vld [vmem:[%s942_s0 + $0x80] sm:$0xff]  ;;  %v44_v53 = vld [vmem:[%s942_s0 + $0x88] sm:$0xff] }
   0xd   :  { %499 = vmatpush1.bf16.msra.mxu1 %v498_v19  ;;  %473 = vmatprep.subr.bf16.mxu0 %v576_v0  ;;  %v513_v51 = vpack.c.bf16 %v147_v48, %v146_v47  ;;  %v430_v54 = vld [vmem:[%s945_s5 + $0x8] sm:$0xff]  ;;  %v148_v55 = vld [vmem:[%s943_s1 + $0x80] sm:$0xff]  ;;  %v489_v57 = vpack.c.bf16 %v44_v53, %v43_v52  ;;  %v45_v62 = vld [vmem:[%s942_s0 + $0x90] sm:$0x3f] }
   0xe   :  { %500 = vmatprep.subr.bf16.mxu1 %v576_v0  ;;  %v149_v56 = vld [vmem:[%s943_s1 + $0x88] sm:$0xff]  ;;  %v231_v59 = vld [vmem:[%s946_s2] sm:$0xff]  ;;  %v150_v3 = vld [vmem:[%s943_s1 + $0x90] sm:$0x3f] }
   0xf   :  { %v516_v58 = vpack.c.bf16 %v149_v56, %v148_v55  ;;  %v232_v60 = vld [vmem:[%s946_s2 + $0x8] sm:$0xff]  ;;  %v330_v63 = vld [vmem:[%s947_s3] sm:$0xff]  ;;  %v233_v6 = vld [vmem:[%s946_s2 + $0x10] sm:$0xff] }
  0x10   :  { %475 = vmatpush1.bf16.msra.mxu0 %v474_v24  ;;  %438 = vperm.xlu0 %575, %v430_v54   ;;  %v331_v1 = vld [vmem:[%s947_s3 + $0x8] sm:$0xff]  ;;  %v775_v2 = vld [vmem:[%s944_s4] sm:$0xff]  ;;  %v519_v4 = vpack.c.bf16 %v232_v60, %v231_v59  ;;  %v234_v7 = vld [vmem:[%s946_s2 + $0x18] sm:$0xff] }
  0x11   :  { %502 = vmatpush1.bf16.msra.mxu1 %v501_v25  ;;  %476 = vmatprep.subr.bf16.mxu0 %v576_v0  ;;  %v546_v5 = vpack.c.bf16 %v331_v1, %v330_v63  ;;  %v332_v8 = vld [vmem:[%s947_s3 + $0x10] sm:$0xff]  ;;  %v333_v9 = vld [vmem:[%s947_s3 + $0x18] sm:$0xff]  ;;  %v522_v11 = vpack.c.bf16 %v234_v7, %v233_v6  ;;  %v235_v14 = vld [vmem:[%s946_s2 + $0x20] sm:$0xff] }
  0x12   :  { %503 = vmatprep.subr.bf16.mxu1 %v576_v0  ;;  %v800_v10 = vld [vmem:[%s944_s4 + $0x18] sm:$0xff]  ;;  %v806_v12 = vld [vmem:[%s944_s4 + $0x10] sm:$0xff]  ;;  %v549_v13 = vpack.c.bf16 %v333_v9, %v332_v8  ;;  %v236_v15 = vld [vmem:[%s946_s2 + $0x28] sm:$0xff] }
  0x13   :  { %v334_v16 = vld [vmem:[%s947_s3 + $0x20] sm:$0xff]  ;;  %v335_v17 = vld [vmem:[%s947_s3 + $0x28] sm:$0xff]  ;;  %v525_v18 = vpack.c.bf16 %v236_v15, %v235_v14  ;;  %v237_v20 = vld [vmem:[%s946_s2 + $0x30] sm:$0xff] }
  0x14   :  { %478 = vmatpush1.bf16.msra.mxu0 %v477_v31  ;;  %v552_v19 = vpack.c.bf16 %v335_v17, %v334_v16  ;;  %v238_v21 = vld [vmem:[%s946_s2 + $0x38] sm:$0xff]  ;;  %v336_v22 = vld [vmem:[%s947_s3 + $0x30] sm:$0xff]  ;;  %v239_v26 = vld [vmem:[%s946_s2 + $0x40] sm:$0xff] }
  0x15   :  { %505 = vmatpush1.bf16.msra.mxu1 %v504_v32  ;;  %479 = vmatprep.subr.bf16.mxu0 %v576_v0  ;;  %v337_v23 = vld [vmem:[%s947_s3 + $0x38] sm:$0xff]  ;;  %v528_v24 = vpack.c.bf16 %v238_v21, %v237_v20  ;;  %v240_v27 = vld [vmem:[%s946_s2 + $0x48] sm:$0xff]  ;;  %v241_v32 = vld [vmem:[%s946_s2 + $0x50] sm:$0xff] }
  0x16   :  { %506 = vmatprep.subr.bf16.mxu1 %v576_v0  ;;  %v555_v25 = vpack.c.bf16 %v337_v23, %v336_v22  ;;  %v339_v29 = vld [vmem:[%s947_s3 + $0x48] sm:$0xff]  ;;  %v531_v30 = vpack.c.bf16 %v240_v27, %v239_v26  ;;  %v242_v33 = vld [vmem:[%s946_s2 + $0x58] sm:$0xff]  ;;  %v340_v34 = vld [vmem:[%s947_s3 + $0x50] sm:$0xff] }
  0x17   :  { %v341_v35 = vld [vmem:[%s947_s3 + $0x58] sm:$0xff]  ;;  %v534_v36 = vpack.c.bf16 %v242_v33, %v241_v32  ;;  %v244_v39 = vld [vmem:[%s946_s2 + $0x68] sm:$0xff]  ;;  %v342_v40 = vld [vmem:[%s947_s3 + $0x60] sm:$0xff] }
  0x18   :  { %481 = vmatpush1.bf16.msra.mxu0 %v480_v37  ;;  %v561_v37 = vpack.c.bf16 %v341_v35, %v340_v34  ;;  %v343_v41 = vld [vmem:[%s947_s3 + $0x68] sm:$0xff]  ;;  %v246_v45 = vld [vmem:[%s946_s2 + $0x78] sm:$0xff]  ;;  %v344_v46 = vld [vmem:[%s947_s3 + $0x70] sm:$0xff] }
  0x19   :  { %508 = vmatpush1.bf16.msra.mxu1 %v507_v38  ;;  %482 = vmatprep.subr.bf16.mxu0 %v576_v0  ;;  %v243_v38 = vld [vmem:[%s946_s2 + $0x60] sm:$0xff]  ;;  %v345_v47 = vld [vmem:[%s947_s3 + $0x78] sm:$0xff]  ;;  %v347_v53 = vld [vmem:[%s947_s3 + $0x88] sm:$0xff] }
  0x1a   :  { %509 = vmatprep.subr.bf16.mxu1 %v576_v0  ;;  %v537_v42 = vpack.c.bf16 %v244_v39, %v243_v38  ;;  %v567_v49 = vpack.c.bf16 %v345_v47, %v344_v46  ;;  %v346_v52 = vld [vmem:[%s947_s3 + $0x80] sm:$0xff]  ;;  %v249_v56 = vld [vmem:[%s946_s2 + $0x90] sm:$0x3f] }
  0x1b   :  { %v570_v55 = vpack.c.bf16 %v347_v53, %v346_v52 }
  0x1c   :  { %484 = vmatpush1.bf16.msra.mxu0 %v483_v43  ;;  %v564_v43 = vpack.c.bf16 %v343_v41, %v342_v40 }
  0x1d   :  { %511 = vmatpush1.bf16.msra.mxu1 %v510_v44  ;;  %485 = vmatprep.subr.bf16.mxu0 %v576_v0  ;;  %v245_v44 = vld [vmem:[%s946_s2 + $0x70] sm:$0xff] }
  0x1e   :  { %512 = vmatprep.subr.bf16.mxu1 %v576_v0  ;;  %v540_v48 = vpack.c.bf16 %v246_v45, %v245_v44 }
  0x20   :  { %487 = vmatpush1.bf16.msra.mxu0 %v486_v50  ;;  %v247_v50 = vld [vmem:[%s946_s2 + $0x80] sm:$0xff] }
  0x21   :  { %514 = vmatpush1.bf16.msra.mxu1 %v513_v51  ;;  %488 = vmatprep.subr.bf16.mxu0 %v576_v0  ;;  %v248_v51 = vld [vmem:[%s946_s2 + $0x88] sm:$0xff] }
  0x22   :  { %515 = vmatprep.subr.bf16.mxu1 %v576_v0  ;;  %v543_v54 = vpack.c.bf16 %v248_v51, %v247_v50 }
  0x24   :  { %490 = vmatpush1.bf16.msra.mxu0 %v489_v57  ;;  %v348_v57 = vld [vmem:[%s947_s3 + $0x90] sm:$0x3f] }
  0x25   :  { %517 = vmatpush1.bf16.msra.mxu1 %v516_v58  ;;  %93 = vmatprep.subr.mxu0 %v578_v61 }
  0x26   :  { %190 = vmatprep.subr.mxu1 %v578_v61 }
  0x28   :  { %452 = vmatpush1.msk.msra.mxu0 %vm53_vm1, %v45_v62 }
  0x29   :  { %122 = vmatmul.mubr.f32.vlgmr.msra.gmra.mrb[0].mxu0 %v775_v2  ;;  %455 = vmatpush1.msk.msra.mxu1 %vm53_vm1, %v150_v3 }
  0x2a   :  { %518 = vmatprep.subr.bf16.mxu0 %v576_v0  ;;  %219 = vmatmul.mubr.f32.vlgmr.msra.gmra.mrb[0].mxu1 %v775_v2 }
  0x2b   :  { %520 = vmatpush1.bf16.msra.mxu0 %v519_v4  ;;  %545 = vmatprep.subr.bf16.mxu1 %v576_v0 }
  0x2c   :  { %547 = vmatpush1.bf16.msra.mxu1 %v546_v5  ;;  %521 = vmatprep.subr.bf16.mxu0 %v576_v0 }
  0x2d   :  { %548 = vmatprep.subr.bf16.mxu1 %v576_v0  ;;  %454 = vmatprep.mubr.msk.f32.mxu0 %vm46_vm0, %v800_v10 }
  0x2e   :  { %127 = vmatmul.mubr.f32.gmra.mrb[2].mxu0 %v806_v12  ;;  %457 = vmatprep.mubr.msk.f32.mxu1 %vm46_vm0, %v800_v10 }
  0x2f   :  { %523 = vmatpush1.bf16.msra.mxu0 %v522_v11  ;;  %224 = vmatmul.mubr.f32.gmra.mrb[2].mxu1 %v806_v12 }
  0x30   :  { %550 = vmatpush1.bf16.msra.mxu1 %v549_v13  ;;  %524 = vmatprep.subr.bf16.mxu0 %v576_v0 }
  0x31   :  { %551 = vmatprep.subr.bf16.mxu1 %v576_v0  ;;  %459 = vmatprep.mubr.msk.f32.mxu0 %vm46_vm0, %v678_v28 }
  0x32   :  { %462 = vmatprep.mubr.msk.f32.mxu1 %vm46_vm0, %v678_v28  ;;  %v338_v28 = vld [vmem:[%s947_s3 + $0x40] sm:$0xff] }
  0x33   :  { %526 = vmatpush1.bf16.msra.mxu0 %v525_v18  ;;  %v558_v31 = vpack.c.bf16 %v339_v29, %v338_v28 }
  0x34   :  { %553 = vmatpush1.bf16.msra.mxu1 %v552_v19  ;;  %527 = vmatprep.subr.bf16.mxu0 %v576_v0 }
  0x35   :  { %554 = vmatprep.subr.bf16.mxu1 %v576_v0 }
  0x37   :  { %529 = vmatpush1.bf16.msra.mxu0 %v528_v24 }
  0x38   :  { %556 = vmatpush1.bf16.msra.mxu1 %v555_v25  ;;  %530 = vmatprep.subr.bf16.mxu0 %v576_v0 }
  0x39   :  { %557 = vmatprep.subr.bf16.mxu1 %v576_v0 }
  0x3b   :  { %532 = vmatpush1.bf16.msra.mxu0 %v531_v30 }
  0x3c   :  { %559 = vmatpush1.bf16.msra.mxu1 %v558_v31  ;;  %533 = vmatprep.subr.bf16.mxu0 %v576_v0 }
  0x3d   :  { %560 = vmatprep.subr.bf16.mxu1 %v576_v0 }
  0x3f   :  { %535 = vmatpush1.bf16.msra.mxu0 %v534_v36 }
  0x40   :  { %562 = vmatpush1.bf16.msra.mxu1 %v561_v37  ;;  %536 = vmatprep.subr.bf16.mxu0 %v576_v0 }
  0x41   :  { %563 = vmatprep.subr.bf16.mxu1 %v576_v0 }
  0x43   :  { %538 = vmatpush1.bf16.msra.mxu0 %v537_v42 }
  0x44   :  { %565 = vmatpush1.bf16.msra.mxu1 %v564_v43  ;;  %539 = vmatprep.subr.bf16.mxu0 %v576_v0 }
  0x45   :  { %566 = vmatprep.subr.bf16.mxu1 %v576_v0 }
  0x47   :  { %541 = vmatpush1.bf16.msra.mxu0 %v540_v48 }
  0x48   :  { %568 = vmatpush1.bf16.msra.mxu1 %v567_v49  ;;  %542 = vmatprep.subr.bf16.mxu0 %v576_v0 }
  0x49   :  { %569 = vmatprep.subr.bf16.mxu1 %v576_v0 }
  0x4b   :  { %544 = vmatpush1.bf16.msra.mxu0 %v543_v54 }
  0x4c   :  { %571 = vmatpush1.bf16.msra.mxu1 %v570_v55  ;;  %289 = vmatprep.subr.mxu0 %v578_v61 }
  0x4d   :  { %388 = vmatprep.subr.mxu1 %v578_v61 }
  0x4f   :  { %458 = vmatpush1.msk.msra.mxu0 %vm53_vm1, %v249_v56 }
  0x50   :  { %318 = vmatmul.mubr.f32.vlgmr.msra.gmra.mrb[4].mxu0 %v775_v2  ;;  %461 = vmatpush1.msk.msra.mxu1 %vm53_vm1, %v348_v57 }
  0x51   :  { %417 = vmatmul.mubr.f32.vlgmr.msra.gmra.mrb[4].mxu1 %v775_v2  ;;  %460 = vmatprep.mubr.msk.f32.mxu0 %vm46_vm0, %v800_v10 }
  0x52   :  { %463 = vmatprep.mubr.msk.f32.mxu1 %vm46_vm0, %v800_v10 }
  0x54   :  { %323 = vmatmul.mubr.f32.gmra.mrb[6].mxu0 %v806_v12 }
  0x55   :  { %422 = vmatmul.mubr.f32.gmra.mrb[6].mxu1 %v806_v12 }
  0x8b   :  { %v434_v8 = vpop.permute.xlu0 %433 }
  0x8f   :  { %v439_v19 = vpop.permute.xlu0 %438 }
  0xfc   :  { %v123_v0 = vpop.f32.mrb[0].mxu0 }
  0xfd   :  { %v125_v58 = vpop.f32.mrb[1].mxu0  ;;  %v220_v59 = vpop.f32.mrb[0].mxu1 }
  0xfe   :  { %v229_v60 = vmax.f32 %v123_v0, %v220_v59  ;;  %v222_v61 = vpop.f32.mrb[1].mxu1 }
 0x101   :  { %v128_v62 = vpop.f32.mrb[2].mxu0 }
 0x102   :  { %v130_v63 = vpop.f32.mrb[3].mxu0  ;;  %v225_v1 = vpop.f32.mrb[2].mxu1 }
 0x103   :  { %v230_v3 = vmax.f32 %v128_v62, %v225_v1  ;;  %v227_v2 = vpop.f32.mrb[3].mxu1 }
 0x123   :  { %v319_v4 = vpop.f32.mrb[4].mxu0 }
 0x124   :  { %v328_v5 = vmax.f32 %v229_v60, %v319_v4  ;;  %v321_v6 = vpop.f32.mrb[5].mxu0  ;;  %v418_v7 = vpop.f32.mrb[4].mxu1 }
 0x125   :  { %v420_v9 = vpop.f32.mrb[5].mxu1 }
 0x126   :  { %v427_v10 = vmax.f32 %v328_v5, %v418_v7 }
 0x127   :  { %v324_v11 = vpop.f32.mrb[6].mxu0 }
 0x128   :  { %v441_v13 = vadd.f32 %v434_v8, %v427_v10  ;;  %v329_v12 = vmax.f32 %v230_v3, %v324_v11  ;;  %v326_v14 = vpop.f32.mrb[7].mxu0  ;;  %v423_v15 = vpop.f32.mrb[6].mxu1 }
 0x129   :  { %v425_v16 = vpop.f32.mrb[7].mxu1 }
 0x12a   :  { %v443_v17 = vmax.f32 %v441_v13, 0.0  ;;  %v428_v18 = vmax.f32 %v329_v12, %v423_v15 }
 0x12c   :  { %446 = vst.msk [vmem:[%s948_s6] sm:$0xff] %vm445_vm2, %v443_v17  ;;  %v442_v20 = vadd.f32 %v439_v19, %v428_v18 }
 0x12e   :  { %v444_v21 = vmax.f32 %v442_v20, 0.0 }
 0x130   :  { %447 = vst.msk [vmem:[%s948_s6 + $0x8] sm:$0xff] %vm445_vm2, %v444_v21 }

// kernel: net_forward.5
= control target key start
LH: loop header
LB: loop body
LE: loop exit
PB: predicated region body
PF: predicated region fallthrough
CT: control target
= control target key end

     0   :  { %v712_v4 = vmov 0.0|0.0   ;;  %v713_v26 = vmov 1983009808   ;;  %v90_v28 = vlaneseq  ;;  %vm106_vm0 = vcmask 130048   ;;  %s1030_s0 = inlined_call_operand.vmem [shape: f32[2,400], index: 0, kind: input, shape index: {}]   ;;  %s1031_s1 = inlined_call_operand.vmem [shape: f32[400,120], index: 1, kind: input, shape index: {}]   ;;  %s1032_s2 = inlined_call_operand.vmem [shape: f32[1,120], index: 2, kind: input, shape index: {}]   ;;  %s1033_s3 = inlined_call_operand.vmem [shape: f32[120,84], index: 3, kind: input, shape index: {}]   ;;  %s1034_s4 = inlined_call_operand.vmem [shape: f32[1,84], index: 4, kind: input, shape index: {}]   ;;  %s1035_s5 = inlined_call_operand.vmem [shape: f32[84,10], index: 5, kind: input, shape index: {}]   ;;  %s1036_s6 = inlined_call_operand.vmem [shape: f32[1,10], index: 6, kind: input, shape index: {}]   ;;  %s1037_s7 = inlined_call_operand.hbm [shape: f32[2,10], index: 7, kind: output, shape index: {}]  }
   0x1   :  { %v44_v0 = vld [vmem:[%s1031_s1 + $0x80] sm:$0xff]  ;;  %v45_v1 = vld [vmem:[%s1031_s1 + $0x88] sm:$0xff]  ;;  %619 = vmatprep.subr.bf16.mxu1 %v712_v4  ;;  %v46_v10 = vld [vmem:[%s1031_s1 + $0x90] sm:$0xff]  ;;  %v88_v27 = vunpack.c.l.s4 %v713_v26 }
   0x2   :  { %v28_v2 = vld [vmem:[%s1031_s1] sm:$0xff]  ;;  %v587_v3 = vpack.c.bf16 %v45_v1, %v44_v0  ;;  %v29_v5 = vld [vmem:[%s1031_s1 + $0x8] sm:$0xff]  ;;  %v47_v11 = vld [vmem:[%s1031_s1 + $0x98] sm:$0xff]  ;;  %v91_v39 = vshrl.u32 %v90_v28, 7 }
   0x3   :  { %v60_v6 = vld [vmem:[%s1031_s1 + $0x100] sm:$0xff]  ;;  %v61_v7 = vld [vmem:[%s1031_s1 + $0x108] sm:$0xff]  ;;  %v589_v8 = vpack.c.bf16 %v29_v5, %v28_v2  ;;  %v30_v12 = vld [vmem:[%s1031_s1 + $0x10] sm:$0xff]  ;;  %v591_v13 = vpack.c.bf16 %v47_v11, %v46_v10  ;;  %v89_v38 = vunpack.c.0.s8 %v88_v27 }
   0x4   :  { %v620_v9 = vpack.c.bf16 %v61_v7, %v60_v6  ;;  %588 = vmatprep.subr.bf16.mxu0 %v587_v3  ;;  %v31_v14 = vld [vmem:[%s1031_s1 + $0x18] sm:$0xff]  ;;  %v62_v15 = vld [vmem:[%s1031_s1 + $0x110] sm:$0xff]  ;;  %v48_v19 = vld [vmem:[%s1031_s1 + $0xa0] sm:$0xff] }
   0x5   :  { %v63_v16 = vld [vmem:[%s1031_s1 + $0x118] sm:$0xff]  ;;  %590 = vmatpush3.bf16.msra.mxu0 %v589_v8  ;;  %v593_v17 = vpack.c.bf16 %v31_v14, %v30_v12  ;;  %v49_v20 = vld [vmem:[%s1031_s1 + $0xa8] sm:$0xff]  ;;  %v32_v21 = vld [vmem:[%s1031_s1 + $0x20] sm:$0xff]  ;;  %v92_v49 = vsub.s32 %v89_v38, %v91_v39 }
   0x6   :  { %621 = vmatpush1.bf16.msra.mxu1 %v620_v9  ;;  %v623_v18 = vpack.c.bf16 %v63_v16, %v62_v15  ;;  %592 = vmatprep.subr.bf16.mxu0 %v591_v13  ;;  %v595_v22 = vpack.c.bf16 %v49_v20, %v48_v19  ;;  %v33_v23 = vld [vmem:[%s1031_s1 + $0x28] sm:$0xff]  ;;  %v64_v24 = vld [vmem:[%s1031_s1 + $0x120] sm:$0xff]  ;;  %v50_v29 = vld [vmem:[%s1031_s1 + $0xb0] sm:$0xff] }
   0x7   :  { %622 = vmatprep.subr.bf16.mxu1 %v712_v4  ;;  %v65_v25 = vld [vmem:[%s1031_s1 + $0x128] sm:$0xff]  ;;  %v51_v30 = vld [vmem:[%s1031_s1 + $0xb8] sm:$0xff]  ;;  %v597_v31 = vpack.c.bf16 %v33_v23, %v32_v21  ;;  %v34_v33 = vld [vmem:[%s1031_s1 + $0x30] sm:$0xff] }
   0x8   :  { %v626_v32 = vpack.c.bf16 %v65_v25, %v64_v24  ;;  %v599_v34 = vpack.c.bf16 %v51_v30, %v50_v29  ;;  %v35_v35 = vld [vmem:[%s1031_s1 + $0x38] sm:$0xff]  ;;  %v66_v36 = vld [vmem:[%s1031_s1 + $0x130] sm:$0xff]  ;;  %v52_v40 = vld [vmem:[%s1031_s1 + $0xc0] sm:$0xff] }
   0x9   :  { %594 = vmatpush3.bf16.msra.mxu0 %v593_v17  ;;  %v67_v37 = vld [vmem:[%s1031_s1 + $0x138] sm:$0xff]  ;;  %v53_v41 = vld [vmem:[%s1031_s1 + $0xc8] sm:$0xff]  ;;  %v601_v42 = vpack.c.bf16 %v35_v35, %v34_v33  ;;  %v36_v44 = vld [vmem:[%s1031_s1 + $0x40] sm:$0xff] }
   0xa   :  { %624 = vmatpush1.bf16.msra.mxu1 %v623_v18  ;;  %596 = vmatprep.subr.bf16.mxu0 %v595_v22  ;;  %v629_v43 = vpack.c.bf16 %v67_v37, %v66_v36  ;;  %v603_v45 = vpack.c.bf16 %v53_v41, %v52_v40  ;;  %v37_v46 = vld [vmem:[%s1031_s1 + $0x48] sm:$0xff]  ;;  %v68_v47 = vld [vmem:[%s1031_s1 + $0x140] sm:$0xff]  ;;  %v54_v50 = vld [vmem:[%s1031_s1 + $0xd0] sm:$0xff] }
   0xb   :  { %625 = vmatprep.subr.bf16.mxu1 %v712_v4  ;;  %v69_v48 = vld [vmem:[%s1031_s1 + $0x148] sm:$0xff]  ;;  %v55_v51 = vld [vmem:[%s1031_s1 + $0xd8] sm:$0xff]  ;;  %v605_v52 = vpack.c.bf16 %v37_v46, %v36_v44  ;;  %v38_v54 = vld [vmem:[%s1031_s1 + $0x50] sm:$0xff] }
   0xc   :  { %v632_v53 = vpack.c.bf16 %v69_v48, %v68_v47  ;;  %v27_v55 = vld [vmem:[%s1030_s0] sm:$0xff]  ;;  %v607_v56 = vpack.c.bf16 %v55_v51, %v54_v50  ;;  %v39_v57 = vld [vmem:[%s1031_s1 + $0x58] sm:$0xff]  ;;  %v70_v58 = vld [vmem:[%s1031_s1 + $0x150] sm:$0xff] }
   0xd   :  { %598 = vmatpush3.bf16.msra.mxu0 %v597_v31  ;;  %v71_v59 = vld [vmem:[%s1031_s1 + $0x158] sm:$0xff]  ;;  %v86_v60 = vcombine.high %v27_v55, %v27_v55  ;;  %v93_v61 = vrot.slane %v27_v55, %v92_v49  ;;  %v56_v62 = vld [vmem:[%s1031_s1 + $0xe0] sm:$0xff]  ;;  %v57_v63 = vld [vmem:[%s1031_s1 + $0xe8] sm:$0xff]  ;;  %v609_v2 = vpack.c.bf16 %v39_v57, %v38_v54 }
   0xe   :  { %627 = vmatpush1.bf16.msra.mxu1 %v626_v32  ;;  %600 = vmatprep.subr.bf16.mxu0 %v599_v34  ;;  %v635_v3 = vpack.c.bf16 %v71_v59, %v70_v58  ;;  %v40_v5 = vld [vmem:[%s1031_s1 + $0x60] sm:$0xff] }
   0xf   :  { %628 = vmatprep.subr.bf16.mxu1 %v712_v4  ;;  %v101_v0 = vcombine.high %v93_v61, %v93_v61  ;;  %v100_v1 = vrot.slane %v86_v60, %v92_v49 }
  0x11   :  { %602 = vmatpush3.bf16.msra.mxu0 %v601_v42 }
  0x12   :  { %630 = vmatpush1.bf16.msra.mxu1 %v629_v43  ;;  %604 = vmatprep.subr.bf16.mxu0 %v603_v45 }
  0x13   :  { %631 = vmatprep.subr.bf16.mxu1 %v712_v4 }
  0x15   :  { %606 = vmatpush3.bf16.msra.mxu0 %v605_v52 }
  0x16   :  { %633 = vmatpush1.bf16.msra.mxu1 %v632_v53 }
  0x17   :  { %12 = vsyncpa [#allocation3], 0  ;;  %608 = vmatprep.subr.bf16.mxu0 %v607_v56  ;;  %634 = vmatprep.subr.bf16.mxu1 %v712_v4  ;;  %v611_v6 = vpack.c.bf16 %v57_v63, %v56_v62  ;;  %v41_v7 = vld [vmem:[%s1031_s1 + $0x68] sm:$0xff]  ;;  %v72_v8 = vld [vmem:[%s1031_s1 + $0x160] sm:$0xff]  ;;  %v102_v10 = vcombine.high %v100_v1, %v100_v1  ;;  %v714_v46 = vmov 0.0   ;;  %vm715_vm1 = vmmov 0  }
  0x18   :  { %v73_v9 = vld [vmem:[%s1031_s1 + $0x168] sm:$0xff]  ;;  %v58_v11 = vld [vmem:[%s1031_s1 + $0xf0] sm:$0xff]  ;;  %v59_v12 = vld [vmem:[%s1031_s1 + $0xf8] sm:$0xff]  ;;  %173 = vmatprep.mubr.f32.mxu0 %v101_v0  ;;  %v613_v13 = vpack.c.bf16 %v41_v7, %v40_v5  ;;  %vm272_vm2 = vcmask 982016   ;;  %vm369_vm3 = vcmask 1043456   ;;  %vm365_vm4 = vcmask 687104  }
  0x19   :  { %460 = vmatprep.mubr.msk.f32.mxu1 %vm106_vm0, %v102_v10  ;;  %610 = vmatpush3.bf16.msra.mxu0 %v609_v2  ;;  %v638_v14 = vpack.c.bf16 %v73_v9, %v72_v8  ;;  %v42_v15 = vld [vmem:[%s1031_s1 + $0x70] sm:$0xff]  ;;  %v615_v16 = vpack.c.bf16 %v59_v12, %v58_v11  ;;  %v43_v17 = vld [vmem:[%s1031_s1 + $0x78] sm:$0xff]  ;;  %v76_v22 = vld [vmem:[%s1031_s1 + $0x180] sm:$0xff]  ;;  %vm443_vm5 = vcmask 74752  }
  0x1a   :  { %636 = vmatpush1.bf16.msra.mxu1 %v635_v3  ;;  %612 = vmatprep.subr.bf16.mxu0 %v611_v6  ;;  %v74_v18 = vld [vmem:[%s1031_s1 + $0x170] sm:$0xff]  ;;  %v75_v19 = vld [vmem:[%s1031_s1 + $0x178] sm:$0xff]  ;;  %v617_v20 = vpack.c.bf16 %v43_v17, %v42_v15  ;;  %v77_v23 = vld [vmem:[%s1031_s1 + $0x188] sm:$0xff]  ;;  %s716_s1 = smov [#allocation2]  }
  0x1b   :  { %637 = vmatprep.subr.bf16.mxu1 %v712_v4  ;;  %v641_v21 = vpack.c.bf16 %v75_v19, %v74_v18  ;;  %v250_v24 = vld [vmem:[%s1033_s3] sm:$0xff]  ;;  %v251_v25 = vld [vmem:[%s1033_s3 + $0x8] sm:$0xff]  ;;  %v644_v26 = vpack.c.bf16 %v77_v23, %v76_v22  ;;  %v252_v28 = vld [vmem:[%s1033_s3 + $0x10] sm:$0xff]  ;;  %s451_s15 = sshll.u32 %s716_s1, 4  ;;  %s452_s15 = int_to_ptr.vmem [resolvable:$true] %s451_s15 }
  0x1c   :  { %v647_v27 = vpack.c.bf16 %v251_v25, %v250_v24  ;;  %v253_v29 = vld [vmem:[%s1033_s3 + $0x18] sm:$0xff]  ;;  %v254_v31 = vld [vmem:[%s1033_s3 + $0x20] sm:$0xff]  ;;  %v255_v32 = vld [vmem:[%s1033_s3 + $0x28] sm:$0xff]  ;;  %p693_p1 = scmp.lt.s32.totalorder %s452_s15, %s452_s15 }
  0x1d   :  { %614 = vmatpush3.bf16.msra.mxu0 %v613_v13  ;;  %v650_v30 = vpack.c.bf16 %v253_v29, %v252_v28  ;;  %v653_v33 = vpack.c.bf16 %v255_v32, %v254_v31  ;;  %v256_v34 = vld [vmem:[%s1033_s3 + $0x30] sm:$0xff]  ;;  %v257_v35 = vld [vmem:[%s1033_s3 + $0x38] sm:$0xff]  ;;  %v258_v37 = vld [vmem:[%s1033_s3 + $0x40] sm:$0xff] }
  0x1e   :  { %639 = vmatpush1.bf16.msra.mxu1 %v638_v14  ;;  %616 = vmatprep.subr.bf16.mxu0 %v615_v16  ;;  %v656_v36 = vpack.c.bf16 %v257_v35, %v256_v34  ;;  %v259_v38 = vld [vmem:[%s1033_s3 + $0x48] sm:$0xff]  ;;  %v260_v40 = vld [vmem:[%s1033_s3 + $0x50] sm:$0xff]  ;;  %v261_v41 = vld [vmem:[%s1033_s3 + $0x58] sm:$0xff] }
  0x1f   :  { %640 = vmatprep.subr.bf16.mxu1 %v712_v4  ;;  %v659_v39 = vpack.c.bf16 %v259_v38, %v258_v37  ;;  %v662_v42 = vpack.c.bf16 %v261_v41, %v260_v40  ;;  %v262_v43 = vld [vmem:[%s1033_s3 + $0x60] sm:$0xff]  ;;  %v263_v44 = vld [vmem:[%s1033_s3 + $0x68] sm:$0xff]  ;;  %v264_v47 = vld [vmem:[%s1033_s3 + $0x70] sm:$0xff] }
  0x20   :  { %v665_v45 = vpack.c.bf16 %v263_v44, %v262_v43  ;;  %v347_v48 = vld [vmem:[%s1035_s5] sm:$0xff]  ;;  %v348_v49 = vld [vmem:[%s1035_s5 + $0x8] sm:$0xff]  ;;  %v349_v50 = vld [vmem:[%s1035_s5 + $0x10] sm:$0xff] }
  0x21   :  { %618 = vmatpush3.bf16.msra.mxu0 %v617_v20  ;;  %v668_v51 = vpack.c.bf16 %v348_v49, %v347_v48  ;;  %v350_v52 = vld [vmem:[%s1035_s5 + $0x18] sm:$0xff]  ;;  %v351_v54 = vld [vmem:[%s1035_s5 + $0x20] sm:$0xff]  ;;  %v352_v55 = vld [vmem:[%s1035_s5 + $0x28] sm:$0xff] }
  0x22   :  { %642 = vmatpush1.bf16.msra.mxu1 %v641_v21  ;;  %646 = vmatprep.subr.bf16.mxu0 %v712_v4  ;;  %v671_v53 = vpack.c.bf16 %v350_v52, %v349_v50  ;;  %v674_v56 = vpack.c.bf16 %v352_v55, %v351_v54  ;;  %v353_v57 = vld [vmem:[%s1035_s5 + $0x30] sm:$0xff]  ;;  %v354_v58 = vld [vmem:[%s1035_s5 + $0x38] sm:$0xff]  ;;  %v459_v62 = vld [vmem:[%s1032_s2] ss:$0 sm:$0xff] }
  0x23   :  { %643 = vmatprep.subr.bf16.mxu1 %v712_v4  ;;  %v677_v59 = vpack.c.bf16 %v354_v58, %v353_v57  ;;  %v355_v6 = vld [vmem:[%s1035_s5 + $0x40] sm:$0xff]  ;;  %v357_v8 = vld [vmem:[%s1035_s5 + $0x50] sm:$0xf] }
  0x24   :  { %174 = vmatmul.mubr.f32.vlgmr.msra.gmra.mrb[0].mxu0 %v93_v61  ;;  %v461_v9 = vld [vmem:[%s1034_s4] ss:$0 sm:$0xff] }
  0x25   :  { %648 = vmatpush3.bf16.msra.mxu0 %v647_v27  ;;  %559 = vmatprep.mubr.msk.f32.mxu0 %vm715_vm1, %v714_v46  ;;  %v463_v14 = vld [vmem:[%s1036_s6] ss:$0 sm:$0xff] }
  0x26   :  { %645 = vmatpush1.bf16.msra.mxu1 %v644_v26  ;;  %649 = vmatprep.subr.bf16.mxu0 %v712_v4 }
  0x27   :  { %667 = vmatprep.subr.bf16.mxu1 %v712_v4 }
  0x29   :  { %244 = vmatmul.mubr.f32.vlgmr.msra.gmra.mrb[0].mxu1 %v100_v1  ;;  %651 = vmatpush3.bf16.msra.mxu0 %v650_v30 }
  0x2a   :  { %652 = vmatprep.subr.bf16.mxu0 %v712_v4  ;;  %584 = vmatprep.mubr.msk.f32.mxu1 %vm715_vm1, %v714_v46 }
  0x2b   :  { %669 = vmatpush3.bf16.msra.mxu1 %v668_v51 }
  0x2c   :  { %670 = vmatprep.subr.bf16.mxu1 %v712_v4 }
  0x2d   :  { %654 = vmatpush3.bf16.msra.mxu0 %v653_v33 }
  0x2e   :  { %655 = vmatprep.subr.bf16.mxu0 %v712_v4 }
  0x2f   :  { %672 = vmatpush3.bf16.msra.mxu1 %v671_v53 }
  0x30   :  { %673 = vmatprep.subr.bf16.mxu1 %v712_v4 }
  0x31   :  { %657 = vmatpush3.bf16.msra.mxu0 %v656_v36 }
  0x32   :  { %658 = vmatprep.subr.bf16.mxu0 %v712_v4 }
  0x33   :  { %675 = vmatpush3.bf16.msra.mxu1 %v674_v56 }
  0x34   :  { %676 = vmatprep.subr.bf16.mxu1 %v712_v4 }
  0x35   :  { %660 = vmatpush3.bf16.msra.mxu0 %v659_v39 }
  0x36   :  { %661 = vmatprep.subr.bf16.mxu0 %v712_v4 }
  0x37   :  { %678 = vmatpush3.bf16.msra.mxu1 %v677_v59 }
  0x38   :  { %679 = vmatprep.subr.bf16.mxu1 %v712_v4 }
  0x39   :  { %663 = vmatpush3.bf16.msra.mxu0 %v662_v42 }
  0x3a   :  { %664 = vmatprep.subr.bf16.mxu0 %v712_v4  ;;  %v356_v4 = vld [vmem:[%s1035_s5 + $0x48] sm:$0xff]  ;;  %s688_s5 = scalar_lea.vmem %s452_s15, 32 }
  0x3b   :  { %v680_v7 = vpack.c.bf16 %v356_v4, %v355_v6  ;;  %p689_p0 = scmp.ne.s32.totalorder %s452_s15, %s688_s5  ;;  %p694_p2 = scmp.lt.s32.totalorder %s688_s5, %s688_s5 }
  0x3d   :  { %666 = vmatpush3.bf16.msra.mxu0 %v665_v45  ;;  %681 = vmatpush3.bf16.msra.mxu1 %v680_v7  ;;  %p695_p3 = por %p694_p2, %p693_p1 }
  0x3e   :  { %557 = vmatprep.subr.mxu0 %v714_v46  ;;  %582 = vmatprep.subr.mxu1 %v714_v46 }
  0x3f   :  { %p696_p4 = pnand %p695_p3, %p689_p0 }
  0x41   :  { %558 = vmatpush3.msra.mxu0 %v264_v47  ;;  %583 = vmatpush3.msk.msra.mxu1 %vm369_vm3, %v357_v8 }
  0xf7   :  { %v498_v60 = vpop.f32.mrb[0].mxu0 }
  0xf8   :  { %v499_v61 = vpop.f32.mrb[1].mxu0 }
  0xf9   :  { %v500_v63 = vadd.f32 %v499_v61, %v498_v60 }
  0xfb   :  { %v176_v0 = vadd.f32 %v500_v63, %v459_v62 }
  0xfc   :  { %v245_v1 = vpop.f32.mrb[0].mxu1 }
  0xfd   :  { %v247_v2 = vpop.f32.mrb[1].mxu1  ;;  %v246_v3 = vadd.f32 %v245_v1, %v176_v0 }
  0xff   :  { %v249_v5 = vmax.f32 %v246_v3, 0.0 }
 0x101   :  { %560 = vmatmul.mubr.msk.f32.vlgmr.msra.gmra.mrb[2].mxu0 %vm272_vm2, %v249_v5 }
 0x1d4   :  { %v342_v10 = vpop.f32.mrb[2].mxu0 }
 0x1d5   :  { %v343_v11 = vadd.f32 %v461_v9, %v342_v10  ;;  %v561_v12 = vpop.f32.mrb[3].mxu0 }
 0x1d7   :  { %v346_v13 = vmax.f32 %v343_v11, 0.0 }
 0x1d9   :  { %585 = vmatmul.mubr.msk.f32.vlgmr.msra.gmra.mrb[2].mxu1 %vm365_vm4, %v346_v13 }
 0x2ac   :  { %v439_v15 = vpop.f32.mrb[2].mxu1 }
 0x2ad   :  { %v440_v16 = vadd.f32 %v463_v14, %v439_v15  ;;  %v586_v17 = vpop.f32.mrb[3].mxu1 }
 0x2af   :  { %444 = vst.msk [vmem:[#allocation2] sm:$0x3] %vm443_vm5, %v440_v16 }
 0x2b0   :  { %699 = shalt.err (!%p696_p4)
}
 0x2b1   :  { %s700_s17 = scalar_lea.hbm %s1037_s7, 32 }
 0x2b2   :  { %p701_p5 = scmp.ne.s32.totalorder %s1037_s7, %s700_s17  ;;  %p704_p6 = scmp.lt.u32.totalorder %s700_s17, %s1037_s7 }
 0x2b4   :  { %p706_p7 = pnand %p704_p6, %p701_p5 }
 0x2b6   :  { %709 = shalt.err (!%p706_p7)
}
 0x2b7   :  { %454 = dma.vmem_to_hbm [thread:$0]  %s452_s15, 32, %s1037_s7, [#allocation3]  }
 0x2b8   :  { %710 = dma.done.wait [#allocation3], 32  }
 0x2b9   :  { %711 = vsyncadd [#allocation3], 4294967264 }
 0x2ba   :  { %458 = vsyncpa [#allocation3], 1 }

</bundles_post_ra>
